<compile_context>
chip_gen: v7x
topology: tpu7x:2x2x1
jax: 0.10.0
libtpu: 0.0.40
codegen_flags: <defaults>
</compile_context>

<pallas_src>
import math

import jax
import jax.numpy as jnp
from jax.experimental import pallas as pl
from jax.experimental.pallas import tpu as pltpu


def _nbytes(shape, dtype):
    return math.prod(shape) * jnp.dtype(dtype).itemsize


def _vmem_limit(estimate_bytes):
    """Generation-aware VMEM ceiling (v7x only has 64 MiB per TensorCore)."""
    try:
        cap = int(0.85 * pltpu.get_tpu_info().vmem_capacity_bytes)
    except Exception:                        # older jax / no TPU info available
        cap = 64 << 20                       # conservative: fits every generation
    return int(min(cap, max(32 << 20, estimate_bytes)))


# ----------------------------------------------------------------------------
# Kernel 1: fused attention block   h1 = x + Wo(attn(RMSNorm(x)))
# ----------------------------------------------------------------------------
def make_attention_call(B, E, S, H, n_heads, n_kv_heads, eps):
    assert H % n_heads == 0 and n_heads % n_kv_heads == 0
    hd = H // n_heads
    n_rep = n_heads // n_kv_heads
    Hkv = n_kv_heads * hd
    half = hd // 2
    inv_sqrt_hd = 1.0 / math.sqrt(hd)
    f32, bf16 = jnp.float32, jnp.bfloat16

    def kernel(x_ref, mask_ref, g_in_ref, cos_ref, sin_ref,
               wq_ref, rq_ref, sq_ref, wk_ref, rk_ref, sk_ref,
               wv_ref, rv_ref, sv_ref, wo_ref, ro_ref, so_ref, out_ref):
        x = x_ref[0, 0]                                        # (S, H) f32

        # input RMSNorm (f32)
        var = jnp.mean(x * x, axis=-1, keepdims=True)
        xn = g_in_ref[...] * (x * jax.lax.rsqrt(var + eps))

        def blin(v, w_ref, r_ref, s_ref):
            # BatchLinear ((v * r) @ W) * s ; bf16 MXU inputs, f32 accumulation
            lhs = (v * r_ref[0]).astype(bf16)
            return jnp.dot(lhs, w_ref[...],
                           preferred_element_type=f32) * s_ref[0]

        # TODO(synk): rq/rk/rv differ per projection, so QKV cannot share one
        #             fused LHS; kept as three matmuls.
        xq = blin(xn, wq_ref, rq_ref, sq_ref)                  # (S, H)
        xk = blin(xn, wk_ref, rk_ref, sk_ref)                  # (S, Hkv)
        xv = blin(xn, wv_ref, rv_ref, sv_ref)                  # (S, Hkv)

        # head-batched RoPE: one rotate_half for all heads (no per-head loop)
        cos = cos_ref[...][:, None, :]                         # (S, 1, hd)
        sin = sin_ref[...][:, None, :]

        def rope(t):                                           # (S, nh_any, hd)
            rot = jnp.concatenate([-t[..., half:], t[..., :half]], axis=-1)
            return t * cos + rot * sin

        q = rope(xq.reshape(S, n_heads, hd)).astype(bf16)      # (S, nh, hd)
        k = rope(xk.reshape(S, n_kv_heads, hd)).astype(bf16)   # (S, nkv, hd)
        v = xv.reshape(S, n_kv_heads, hd).astype(bf16)

        # GQA without materializing the K/V repeat: fold n_rep into the q rows
        qg = jnp.transpose(q, (1, 0, 2)).reshape(n_kv_heads, n_rep * S, hd)
        kg = jnp.transpose(k, (1, 0, 2))                       # (nkv, S, hd)
        vg = jnp.transpose(v, (1, 0, 2))                       # (nkv, S, hd)

        scores = jnp.einsum('gqd,gkd->gqk', qg, kg,
                            preferred_element_type=f32) * inv_sqrt_hd
        scores = (scores.reshape(n_kv_heads, n_rep, S, S)
                  + mask_ref[...][None, None])
        scores = scores - jnp.max(scores, axis=-1, keepdims=True)
        p = jnp.exp(scores)
        p = p / jnp.sum(p, axis=-1, keepdims=True)             # exact f32 softmax
        # TODO(synk): for production S add flash-style KV blocking and skip
        #             fully masked blocks instead of dense (S, S) scores.

        p3 = p.reshape(n_kv_heads, n_rep * S, S).astype(bf16)
        o = jnp.einsum('gqk,gkd->gqd', p3, vg,
                       preferred_element_type=f32)             # (nkv, nrep*S, hd)
        attn = jnp.transpose(o.reshape(n_heads, S, hd),
                             (1, 0, 2)).reshape(S, H)          # (S, H) f32

        out_ref[0, 0] = x + blin(attn, wo_ref, ro_ref, so_ref)

    def const(shape):
        return pl.BlockSpec(shape, lambda b, e: (0, 0))

    def ens(dim):
        return pl.BlockSpec((1, 1, dim), lambda b, e: (e, 0, 0))

    in_specs = [
        pl.BlockSpec((1, 1, S, H), lambda b, e: (b, e, 0, 0)),   # x (B,E,S,H)
        const((S, S)),                                           # additive mask
        const((1, H)),                                           # RMSNorm gain
        const((S, hd)), const((S, hd)),                          # cos, sin
        const((H, H)),   ens(H), ens(H),                         # wq, rq, sq
        const((H, Hkv)), ens(H), ens(Hkv),                       # wk, rk, sk
        const((H, Hkv)), ens(H), ens(Hkv),                       # wv, rv, sv
        const((H, H)),   ens(H), ens(H),                         # wo, ro, so
    ]
    # h1 written ensemble-major so the MLP kernel can tile (B*S) rows per e
    out_spec = pl.BlockSpec((1, 1, S, H), lambda b, e: (e, b, 0, 0))

    # TODO(synk): mark constant-index weight blocks pipeline_mode=pl.Buffered(1)
    #             when single-buffering is needed to fit production H on v7x.
    blk = (2 * _nbytes((S, H), f32) + _nbytes((S, S), f32)
           + 2 * _nbytes((S, hd), f32) + _nbytes((1, H), f32)
           + 2 * _nbytes((H, H), bf16) + 2 * _nbytes((H, Hkv), bf16)
           + 6 * _nbytes((1, H), f32) + 2 * _nbytes((1, Hkv), f32))
    interm = 2 * n_heads * S * S * 4 + 10 * _nbytes((S, H), f32)
    limit = _vmem_limit(2 * blk + interm + (4 << 20))

    return pl.pallas_call(
        kernel,
        out_shape=jax.ShapeDtypeStruct((E, B, S, H), f32),
        grid=(B, E),
        in_specs=in_specs,
        out_specs=out_spec,
        compiler_params=pltpu.CompilerParams(
            dimension_semantics=("parallel", "parallel"),
            vmem_limit_bytes=limit),
    )


# ----------------------------------------------------------------------------
# Kernel 2: gated MLP   out = h1 + MLP(RMSNorm(h1)), rows = (B*S) per ensemble
# ----------------------------------------------------------------------------
def make_mlp_call(E, M, H, I, tile_m, tile_i, eps):
    assert M % tile_m == 0 and I % tile_i == 0
    n_m, n_i = M // tile_m, I // tile_i
    f32, bf16 = jnp.float32, jnp.bfloat16

    def kernel(h1_ref, gpost_ref, w1_ref, r1_ref, s1_ref,
               w2_ref, r2_ref, s2_ref, w3_ref, r3_ref, s3_ref,
               out_ref, lhs1_sc, lhs2_sc, acc_sc):
        i = pl.program_id(2)

        @pl.when(i == 0)
        def _init():
            h1 = h1_ref[0]                                     # (tile_m, H) f32
            var = jnp.mean(h1 * h1, axis=-1, keepdims=True)
            hn = gpost_ref[...] * (h1 * jax.lax.rsqrt(var + eps))
            # hoist the bf16 LHS prep (constant across all I tiles)
            lhs1_sc[...] = (hn * r1_ref[0]).astype(bf16)
            lhs2_sc[...] = (hn * r2_ref[0]).astype(bf16)
            acc_sc[...] = jnp.zeros_like(acc_sc)

        a = jnp.dot(lhs1_sc[...], w1_ref[...],
                    preferred_element_type=f32) * s1_ref[0]    # (tile_m, tile_i)
        b = jnp.dot(lhs2_sc[...], w2_ref[...],
                    preferred_element_type=f32) * s2_ref[0]
        g = a * jax.nn.sigmoid(a) * b                          # SiLU(w1 x) * w2 x
        acc_sc[...] += jnp.dot((g * r3_ref[0]).astype(bf16), w3_ref[...],
                               preferred_element_type=f32)

        @pl.when(i == n_i - 1)
        def _finalize():
            out_ref[0] = h1_ref[0] + acc_sc[...] * s3_ref[0]

    row_spec = pl.BlockSpec((1, tile_m, H), lambda e, m, i: (e, m, 0))
    ens_h = pl.BlockSpec((1, 1, H), lambda e, m, i: (e, 0, 0))
    ens_i = pl.BlockSpec((1, 1, tile_i), lambda e, m, i: (e, 0, i))

    in_specs = [
        row_spec,                                              # h1 (E, M, H)
        pl.BlockSpec((1, H), lambda e, m, i: (0, 0)),          # g_post
        pl.BlockSpec((H, tile_i), lambda e, m, i: (0, i)),     # w1
        ens_h, ens_i,                                          # r1, s1
        pl.BlockSpec((H, tile_i), lambda e, m, i: (0, i)),     # w2
        ens_h, ens_i,                                          # r2, s2
        pl.BlockSpec((tile_i, H), lambda e, m, i: (i, 0)),     # w3
        ens_i, ens_h,                                          # r3, s3
    ]

    blk = (2 * _nbytes((tile_m, H), f32)
           + 2 * _nbytes((H, tile_i), bf16) + _nbytes((tile_i, H), bf16)
           + 4 * _nbytes((1, H), f32) + 3 * _nbytes((1, tile_i), f32))
    scratch = 2 * _nbytes((tile_m, H), bf16) + _nbytes((tile_m, H), f32)
    interm = 3 * _nbytes((tile_m, tile_i), f32)
    limit = _vmem_limit(2 * blk + scratch + interm + (4 << 20))

    return pl.pallas_call(
        kernel,
        out_shape=jax.ShapeDtypeStruct((E, M, H), f32),
        grid=(E, n_m, n_i),
        in_specs=in_specs,
        out_specs=row_spec,
        scratch_shapes=[pltpu.VMEM((tile_m, H), bf16),         # (hn*r1) bf16
                        pltpu.VMEM((tile_m, H), bf16),         # (hn*r2) bf16
                        pltpu.VMEM((tile_m, H), f32)],         # MLP accumulator
        compiler_params=pltpu.CompilerParams(
            dimension_semantics=("parallel", "parallel", "arbitrary"),
            vmem_limit_bytes=limit),
    )


# ----------------------------------------------------------------------------
# Glue: parameter init, RoPE tables, wrapper, pure-JAX reference
# ----------------------------------------------------------------------------
def init_batch_linear(key, E, in_f, out_f):
    # mirrors BatchLinear.reset_parameters: std = gain('relu') / sqrt(fan_in)
    std = math.sqrt(2.0) / math.sqrt(in_f)
    kw, kr, ks = jax.random.split(key, 3)
    W = std * jax.random.normal(kw, (in_f, out_f), jnp.float32)
    r = 1.0 + std * jax.random.normal(kr, (E, in_f), jnp.float32)
    s = 1.0 + std * jax.random.normal(ks, (E, out_f), jnp.float32)
    return W, r, s


def rope_tables(S, hd, base=10000.0):
    inv_freq = 1.0 / (base ** (jnp.arange(0, hd, 2, dtype=jnp.float32) / hd))
    t = jnp.arange(S, dtype=jnp.float32)
    freqs = jnp.outer(t, inv_freq)                   # (S, hd/2)
    emb = jnp.concatenate([freqs, freqs], axis=-1)   # (S, hd)
    return jnp.cos(emb), jnp.sin(emb)


def _pick_tile(total, candidates):
    for c in candidates:
        if c <= total and total % c == 0:
            return c
    return total


def decoder_layer_pallas(x, mask, params, cfg, tile_i=None, tile_m=None):
    B, E, S, H = x.shape
    nh, nkv, I, eps = cfg['n_heads'], cfg['n_kv_heads'], cfg['I'], cfg['eps']
    hd = H // nh
    cos, sin = rope_tables(S, hd)

    def tri(W, r, s):
        # shared weight -> bf16 for the MXU; per-ensemble r/s stay f32 (E,1,dim)
        return [W.astype(jnp.bfloat16), r[:, None, :], s[:, None, :]]

    attn = make_attention_call(B, E, S, H, nh, nkv, eps)
    h1 = attn(x, mask, params['g_in'].reshape(1, H), cos, sin,
              *tri(*params['wq']), *tri(*params['wk']),
              *tri(*params['wv']), *tri(*params['wo']))        # (E, B, S, H)

    M = B * S
    tile_m = tile_m or _pick_tile(M, (512, 256, 128, 64, 32, 16, 8))
    tile_i = tile_i or _pick_tile(I, (1024, 512, 256, 128))
    mlp = make_mlp_call(E, M, H, I, tile_m, tile_i, eps)
    out = mlp(h1.reshape(E, M, H), params['g_post'].reshape(1, H),
              *tri(*params['w1']), *tri(*params['w2']), *tri(*params['w3']))
    return jnp.transpose(out.reshape(E, B, S, H), (1, 0, 2, 3))


# pure-JAX f32 reference (mirrors the PyTorch module) -------------------------
def batch_linear_ref(x, W, r, s):
    return jnp.einsum('besi,ei,io,eo->beso', x, r, W, s)


def rms_ref(x, g, eps):
    var = jnp.mean(x * x, axis=-1, keepdims=True)
    return g * (x * jax.lax.rsqrt(var + eps))


def rope_ref(t, cos, sin):
    half = t.shape[-1] // 2
    rot = jnp.concatenate([-t[..., half:], t[..., :half]], axis=-1)
    c = cos[None, None, :, None, :]
    s = sin[None, None, :, None, :]
    return t * c + rot * s


def decoder_layer_ref(x, mask, params, cfg):
    nh, nkv, eps = cfg['n_heads'], cfg['n_kv_heads'], cfg['eps']
    B, E, S, H = x.shape
    hd = H // nh
    n_rep = nh // nkv
    cos, sin = rope_tables(S, hd)

    xn = rms_ref(x, params['g_in'], eps)
    xq = batch_linear_ref(xn, *params['wq']).reshape(B, E, S, nh, hd)
    xk = batch_linear_ref(xn, *params['wk']).reshape(B, E, S, nkv, hd)
    xv = batch_linear_ref(xn, *params['wv']).reshape(B, E, S, nkv, hd)
    xq = rope_ref(xq, cos, sin)
    xk = rope_ref(xk, cos, sin)
    xk = jnp.repeat(xk, n_rep, axis=3)
    xv = jnp.repeat(xv, n_rep, axis=3)
    scores = jnp.einsum('beqhd,bekhd->behqk', xq, xk) / math.sqrt(hd)
    scores = scores + mask[None, None, None]
    p = jax.nn.softmax(scores.astype(jnp.float32), axis=-1)
    o = jnp.einsum('behqk,bekhd->beqhd', p, xv).reshape(B, E, S, H)
    h1 = x + batch_linear_ref(o, *params['wo'])

    hn = rms_ref(h1, params['g_post'], eps)
    a = batch_linear_ref(hn, *params['w1'])
    b = batch_linear_ref(hn, *params['w2'])
    g = jax.nn.silu(a) * b
    return h1 + batch_linear_ref(g, *params['w3'])


# ----------------------------------------------------------------------------
if __name__ == "__main__":
    # small config: batch=2, ensemble=2, seq=16, hidden=64, heads=4, kv_heads=2,
    # intermediate=256; tile_i=128 so the accumulating I axis runs 2 steps.
    B, E, S, H = 2, 2, 16, 64
    n_heads, n_kv_heads, I = 4, 2, 256
    eps = 1e-5
    cfg = dict(n_heads=n_heads, n_kv_heads=n_kv_heads, I=I, eps=eps)
    hd = H // n_heads

    key = jax.random.PRNGKey(0)
    keys = jax.random.split(key, 8)
    params = {
        'g_in': jnp.ones((H,), jnp.float32),        # RMSNorm weights init to 1
        'g_post': jnp.ones((H,), jnp.float32),
        'wq': init_batch_linear(keys[0], E, H, n_heads * hd),
        'wk': init_batch_linear(keys[1], E, H, n_kv_heads * hd),
        'wv': init_batch_linear(keys[2], E, H, n_kv_heads * hd),
        'wo': init_batch_linear(keys[3], E, n_heads * hd, H),
        'w1': init_batch_linear(keys[4], E, H, I),
        'w2': init_batch_linear(keys[5], E, H, I),
        'w3': init_batch_linear(keys[6], E, I, H),
    }
    x = jax.random.normal(keys[7], (B, E, S, H), jnp.float32)

    # causal additive mask (the kernel accepts any additive (S, S) mask)
    causal = jnp.tril(jnp.ones((S, S), jnp.bool_))
    mask = jnp.where(causal, 0.0, -1e9).astype(jnp.float32)

    out = decoder_layer_pallas(x, mask, params, cfg, tile_i=128)
    out = jax.block_until_ready(out)
    ref = decoder_layer_ref(x, mask, params, cfg)

    assert out.shape == (B, E, S, H)
    assert bool(jnp.all(jnp.isfinite(out))), "non-finite values in kernel output"
    err = float(jnp.max(jnp.abs(out - ref)))
    scale = float(jnp.max(jnp.abs(ref))) + 1e-6
    assert err <= 0.03 * scale, (
        f"mismatch vs. pure-JAX reference: max_err={err:.4f}, scale={scale:.4f}")
    print("KERNEL_OK")
</pallas_src>

<mosaic_0001>
module attributes {stable_mosaic.version = 11 : i64} {
  func.func @kernel(%arg0: i32, %arg1: i32, %arg2: memref<1x1x16x64xf32, #tpu.memory_space<vmem>>, %arg3: memref<16x16xf32, #tpu.memory_space<vmem>>, %arg4: memref<1x64xf32, #tpu.memory_space<vmem>>, %arg5: memref<16x16xf32, #tpu.memory_space<vmem>>, %arg6: memref<16x16xf32, #tpu.memory_space<vmem>>, %arg7: memref<64x64xbf16, #tpu.memory_space<vmem>>, %arg8: memref<1x1x64xf32, #tpu.memory_space<vmem>>, %arg9: memref<1x1x64xf32, #tpu.memory_space<vmem>>, %arg10: memref<64x32xbf16, #tpu.memory_space<vmem>>, %arg11: memref<1x1x64xf32, #tpu.memory_space<vmem>>, %arg12: memref<1x1x32xf32, #tpu.memory_space<vmem>>, %arg13: memref<64x32xbf16, #tpu.memory_space<vmem>>, %arg14: memref<1x1x64xf32, #tpu.memory_space<vmem>>, %arg15: memref<1x1x32xf32, #tpu.memory_space<vmem>>, %arg16: memref<64x64xbf16, #tpu.memory_space<vmem>>, %arg17: memref<1x1x64xf32, #tpu.memory_space<vmem>>, %arg18: memref<1x1x64xf32, #tpu.memory_space<vmem>>, %arg19: memref<1x1x16x64xf32, #tpu.memory_space<vmem>>) attributes {dimension_semantics = [#tpu.dimension_semantics<parallel>, #tpu.dimension_semantics<parallel>], iteration_bounds = array<i64: 2, 2>, scalar_prefetch = 0 : i64, scratch_operands = 0 : i64, tpu.core_type = #tpu.core_type<tc>, window_params = [{transform_indices = @transform_0, window_bounds = array<i64: 1, 1, 16, 64>}, {pipeline_mode = #tpu.pipeline_mode<synchronous>, transform_indices = @transform_1, window_bounds = array<i64: 16, 16>}, {pipeline_mode = #tpu.pipeline_mode<synchronous>, transform_indices = @transform_2, window_bounds = array<i64: 1, 64>}, {pipeline_mode = #tpu.pipeline_mode<synchronous>, transform_indices = @transform_3, window_bounds = array<i64: 16, 16>}, {pipeline_mode = #tpu.pipeline_mode<synchronous>, transform_indices = @transform_4, window_bounds = array<i64: 16, 16>}, {pipeline_mode = #tpu.pipeline_mode<synchronous>, transform_indices = @transform_5, window_bounds = array<i64: 64, 64>}, {transform_indices = @transform_6, window_bounds = array<i64: 1, 1, 64>}, {transform_indices = @transform_7, window_bounds = array<i64: 1, 1, 64>}, {pipeline_mode = #tpu.pipeline_mode<synchronous>, transform_indices = @transform_8, window_bounds = array<i64: 64, 32>}, {transform_indices = @transform_9, window_bounds = array<i64: 1, 1, 64>}, {transform_indices = @transform_10, window_bounds = array<i64: 1, 1, 32>}, {pipeline_mode = #tpu.pipeline_mode<synchronous>, transform_indices = @transform_11, window_bounds = array<i64: 64, 32>}, {transform_indices = @transform_12, window_bounds = array<i64: 1, 1, 64>}, {transform_indices = @transform_13, window_bounds = array<i64: 1, 1, 32>}, {pipeline_mode = #tpu.pipeline_mode<synchronous>, transform_indices = @transform_14, window_bounds = array<i64: 64, 64>}, {transform_indices = @transform_15, window_bounds = array<i64: 1, 1, 64>}, {transform_indices = @transform_16, window_bounds = array<i64: 1, 1, 64>}, {transform_indices = @transform_17, window_bounds = array<i64: 1, 1, 16, 64>}]} {
    %c0 = arith.constant 0 : index
    %c0_0 = arith.constant 0 : index
    %c0_1 = arith.constant 0 : index
    %c0_2 = arith.constant 0 : index
    %0 = vector.load %arg2[%c0, %c0_0, %c0_1, %c0_2] : memref<1x1x16x64xf32, #tpu.memory_space<vmem>>, vector<1x1x16x64xf32>
    %1 = vector.shape_cast %0 : vector<1x1x16x64xf32> to vector<16x64xf32>
    %2 = arith.mulf %1, %1 : vector<16x64xf32>
    %cst = arith.constant dense<0.000000e+00> : vector<16xf32>
    %3 = vector.multi_reduction <add>, %2, %cst [1] : vector<16x64xf32> to vector<16xf32>
    %4 = vector.shape_cast %3 : vector<16xf32> to vector<16x1xf32>
    %cst_3 = arith.constant 6.400000e+01 : f32
    %5 = vector.broadcast %cst_3 : f32 to vector<16x1xf32>
    %6 = arith.divf %4, %5 : vector<16x1xf32>
    %c0_4 = arith.constant 0 : index
    %c0_5 = arith.constant 0 : index
    %7 = vector.load %arg4[%c0_4, %c0_5] : memref<1x64xf32, #tpu.memory_space<vmem>>, vector<1x64xf32>
    %cst_6 = arith.constant 9.99999974E-6 : f32
    %8 = vector.broadcast %cst_6 : f32 to vector<16x1xf32>
    %9 = arith.addf %6, %8 : vector<16x1xf32>
    %10 = math.rsqrt %9 : vector<16x1xf32>
    %11 = vector.broadcast %10 : vector<16x1xf32> to vector<16x64xf32>
    %12 = arith.mulf %1, %11 : vector<16x64xf32>
    %13 = vector.broadcast %7 : vector<1x64xf32> to vector<16x64xf32>
    %14 = arith.mulf %13, %12 : vector<16x64xf32>
    %c0_7 = arith.constant 0 : index
    %c0_8 = arith.constant 0 : index
    %c0_9 = arith.constant 0 : index
    %15 = vector.load %arg8[%c0_7, %c0_8, %c0_9] : memref<1x1x64xf32, #tpu.memory_space<vmem>>, vector<1x1x64xf32>
    %16 = vector.shape_cast %15 : vector<1x1x64xf32> to vector<1x64xf32>
    %17 = vector.broadcast %16 : vector<1x64xf32> to vector<16x64xf32>
    %18 = arith.mulf %14, %17 : vector<16x64xf32>
    %19 = arith.truncf %18 : vector<16x64xf32> to vector<16x64xbf16>
    %c0_10 = arith.constant 0 : index
    %c0_11 = arith.constant 0 : index
    %20 = vector.load %arg7[%c0_10, %c0_11] : memref<64x64xbf16, #tpu.memory_space<vmem>>, vector<64x64xbf16>
    %cst_12 = arith.constant dense<0.000000e+00> : vector<16x64xf32>
    %21 = tpu.matmul %19, %20, %cst_12 {dimension_numbers = #tpu.dot_dimension_numbers<[1], [0], [0], [1], [0, 0, 1, 1], [], []>} : vector<16x64xbf16>, vector<64x64xbf16>, vector<16x64xf32> -> vector<16x64xf32>
    %c0_13 = arith.constant 0 : index
    %c0_14 = arith.constant 0 : index
    %c0_15 = arith.constant 0 : index
    %22 = vector.load %arg9[%c0_13, %c0_14, %c0_15] : memref<1x1x64xf32, #tpu.memory_space<vmem>>, vector<1x1x64xf32>
    %23 = vector.shape_cast %22 : vector<1x1x64xf32> to vector<1x64xf32>
    %24 = vector.broadcast %23 : vector<1x64xf32> to vector<16x64xf32>
    %25 = arith.mulf %21, %24 : vector<16x64xf32>
    %c0_16 = arith.constant 0 : index
    %c0_17 = arith.constant 0 : index
    %c0_18 = arith.constant 0 : index
    %26 = vector.load %arg11[%c0_16, %c0_17, %c0_18] : memref<1x1x64xf32, #tpu.memory_space<vmem>>, vector<1x1x64xf32>
    %27 = vector.shape_cast %26 : vector<1x1x64xf32> to vector<1x64xf32>
    %28 = vector.broadcast %27 : vector<1x64xf32> to vector<16x64xf32>
    %29 = arith.mulf %14, %28 : vector<16x64xf32>
    %30 = arith.truncf %29 : vector<16x64xf32> to vector<16x64xbf16>
    %c0_19 = arith.constant 0 : index
    %c0_20 = arith.constant 0 : index
    %31 = vector.load %arg10[%c0_19, %c0_20] : memref<64x32xbf16, #tpu.memory_space<vmem>>, vector<64x32xbf16>
    %cst_21 = arith.constant dense<0.000000e+00> : vector<16x32xf32>
    %32 = tpu.matmul %30, %31, %cst_21 {dimension_numbers = #tpu.dot_dimension_numbers<[1], [0], [0], [1], [0, 0, 1, 1], [], []>} : vector<16x64xbf16>, vector<64x32xbf16>, vector<16x32xf32> -> vector<16x32xf32>
    %c0_22 = arith.constant 0 : index
    %c0_23 = arith.constant 0 : index
    %c0_24 = arith.constant 0 : index
    %33 = vector.load %arg12[%c0_22, %c0_23, %c0_24] : memref<1x1x32xf32, #tpu.memory_space<vmem>>, vector<1x1x32xf32>
    %34 = vector.shape_cast %33 : vector<1x1x32xf32> to vector<1x32xf32>
    %35 = vector.broadcast %34 : vector<1x32xf32> to vector<16x32xf32>
    %36 = arith.mulf %32, %35 : vector<16x32xf32>
    %c0_25 = arith.constant 0 : index
    %c0_26 = arith.constant 0 : index
    %c0_27 = arith.constant 0 : index
    %37 = vector.load %arg14[%c0_25, %c0_26, %c0_27] : memref<1x1x64xf32, #tpu.memory_space<vmem>>, vector<1x1x64xf32>
    %38 = vector.shape_cast %37 : vector<1x1x64xf32> to vector<1x64xf32>
    %39 = vector.broadcast %38 : vector<1x64xf32> to vector<16x64xf32>
    %40 = arith.mulf %14, %39 : vector<16x64xf32>
    %41 = arith.truncf %40 : vector<16x64xf32> to vector<16x64xbf16>
    %c0_28 = arith.constant 0 : index
    %c0_29 = arith.constant 0 : index
    %42 = vector.load %arg13[%c0_28, %c0_29] : memref<64x32xbf16, #tpu.memory_space<vmem>>, vector<64x32xbf16>
    %cst_30 = arith.constant dense<0.000000e+00> : vector<16x32xf32>
    %43 = tpu.matmul %41, %42, %cst_30 {dimension_numbers = #tpu.dot_dimension_numbers<[1], [0], [0], [1], [0, 0, 1, 1], [], []>} : vector<16x64xbf16>, vector<64x32xbf16>, vector<16x32xf32> -> vector<16x32xf32>
    %c0_31 = arith.constant 0 : index
    %c0_32 = arith.constant 0 : index
    %c0_33 = arith.constant 0 : index
    %44 = vector.load %arg15[%c0_31, %c0_32, %c0_33] : memref<1x1x32xf32, #tpu.memory_space<vmem>>, vector<1x1x32xf32>
    %45 = vector.shape_cast %44 : vector<1x1x32xf32> to vector<1x32xf32>
    %46 = vector.broadcast %45 : vector<1x32xf32> to vector<16x32xf32>
    %47 = arith.mulf %43, %46 : vector<16x32xf32>
    %c0_34 = arith.constant 0 : index
    %c0_35 = arith.constant 0 : index
    %48 = vector.load %arg5[%c0_34, %c0_35] : memref<16x16xf32, #tpu.memory_space<vmem>>, vector<16x16xf32>
    %49 = vector.shape_cast %48 : vector<16x16xf32> to vector<16x1x16xf32>
    %c0_36 = arith.constant 0 : index
    %c0_37 = arith.constant 0 : index
    %50 = vector.load %arg6[%c0_36, %c0_37] : memref<16x16xf32, #tpu.memory_space<vmem>>, vector<16x16xf32>
    %51 = vector.shape_cast %50 : vector<16x16xf32> to vector<16x1x16xf32>
    %52 = vector.shape_cast %25 : vector<16x64xf32> to vector<16x4x16xf32>
    %53 = vector.extract_strided_slice %52 {offsets = [0, 0, 8], sizes = [16, 4, 8], strides = [1, 1, 1]} : vector<16x4x16xf32> to vector<16x4x8xf32>
    %cst_38 = arith.constant 0.000000e+00 : f32
    %54 = vector.broadcast %cst_38 : f32 to vector<16x4x8xf32>
    %55 = arith.subf %54, %53 : vector<16x4x8xf32>
    %56 = vector.extract_strided_slice %52 {offsets = [0, 0, 0], sizes = [16, 4, 8], strides = [1, 1, 1]} : vector<16x4x16xf32> to vector<16x4x8xf32>
    %57 = tpu.concatenate %55, %56 in 2 : vector<16x4x8xf32>, vector<16x4x8xf32> -> vector<16x4x16xf32>
    %58 = vector.broadcast %49 : vector<16x1x16xf32> to vector<16x4x16xf32>
    %59 = arith.mulf %52, %58 : vector<16x4x16xf32>
    %60 = vector.broadcast %51 : vector<16x1x16xf32> to vector<16x4x16xf32>
    %61 = arith.mulf %57, %60 : vector<16x4x16xf32>
    %62 = arith.addf %59, %61 : vector<16x4x16xf32>
    %63 = arith.truncf %62 : vector<16x4x16xf32> to vector<16x4x16xbf16>
    %64 = vector.shape_cast %36 : vector<16x32xf32> to vector<16x2x16xf32>
    %65 = vector.extract_strided_slice %64 {offsets = [0, 0, 8], sizes = [16, 2, 8], strides = [1, 1, 1]} : vector<16x2x16xf32> to vector<16x2x8xf32>
    %cst_39 = arith.constant 0.000000e+00 : f32
    %66 = vector.broadcast %cst_39 : f32 to vector<16x2x8xf32>
    %67 = arith.subf %66, %65 : vector<16x2x8xf32>
    %68 = vector.extract_strided_slice %64 {offsets = [0, 0, 0], sizes = [16, 2, 8], strides = [1, 1, 1]} : vector<16x2x16xf32> to vector<16x2x8xf32>
    %69 = tpu.concatenate %67, %68 in 2 : vector<16x2x8xf32>, vector<16x2x8xf32> -> vector<16x2x16xf32>
    %70 = vector.broadcast %49 : vector<16x1x16xf32> to vector<16x2x16xf32>
    %71 = arith.mulf %64, %70 : vector<16x2x16xf32>
    %72 = vector.broadcast %51 : vector<16x1x16xf32> to vector<16x2x16xf32>
    %73 = arith.mulf %69, %72 : vector<16x2x16xf32>
    %74 = arith.addf %71, %73 : vector<16x2x16xf32>
    %75 = arith.truncf %74 : vector<16x2x16xf32> to vector<16x2x16xbf16>
    %76 = vector.shape_cast %47 : vector<16x32xf32> to vector<16x2x16xf32>
    %77 = arith.truncf %76 : vector<16x2x16xf32> to vector<16x2x16xbf16>
    %78 = tpu.transpose %63, [1, 0, 2] : vector<16x4x16xbf16> -> vector<4x16x16xbf16>
    %79 = vector.shape_cast %78 : vector<4x16x16xbf16> to vector<2x32x16xbf16>
    %80 = tpu.transpose %75, [1, 0, 2] : vector<16x2x16xbf16> -> vector<2x16x16xbf16>
    %81 = tpu.transpose %77, [1, 0, 2] : vector<16x2x16xbf16> -> vector<2x16x16xbf16>
    "tpu.trace_start"() <{level = 10 : i32, message = "gqd,gkd->gqk"}> : () -> ()
    %cst_40 = arith.constant dense<0.000000e+00> : vector<2x32x16xf32>
    %82 = tpu.matmul %79, %80, %cst_40 {dimension_numbers = #tpu.dot_dimension_numbers<[2], [2], [1], [1], [0, 0, 0, 1, 1, 1], [0], [0]>} : vector<2x32x16xbf16>, vector<2x16x16xbf16>, vector<2x32x16xf32> -> vector<2x32x16xf32>
    "tpu.trace_stop"() : () -> ()
    %cst_41 = arith.constant 2.500000e-01 : f32
    %83 = vector.broadcast %cst_41 : f32 to vector<2x32x16xf32>
    %84 = arith.mulf %82, %83 : vector<2x32x16xf32>
    %85 = vector.shape_cast %84 : vector<2x32x16xf32> to vector<2x2x16x16xf32>
    %c0_42 = arith.constant 0 : index
    %c0_43 = arith.constant 0 : index
    %86 = vector.load %arg3[%c0_42, %c0_43] : memref<16x16xf32, #tpu.memory_space<vmem>>, vector<16x16xf32>
    %87 = vector.shape_cast %86 : vector<16x16xf32> to vector<1x1x16x16xf32>
    %88 = vector.broadcast %87 : vector<1x1x16x16xf32> to vector<2x2x16x16xf32>
    %89 = arith.addf %85, %88 : vector<2x2x16x16xf32>
    %cst_44 = arith.constant dense<0xFF800000> : vector<2x2x16xf32>
    %90 = vector.multi_reduction <maximumf>, %89, %cst_44 [3] : vector<2x2x16x16xf32> to vector<2x2x16xf32>
    %91 = vector.shape_cast %90 : vector<2x2x16xf32> to vector<2x2x16x1xf32>
    %92 = vector.broadcast %91 : vector<2x2x16x1xf32> to vector<2x2x16x16xf32>
    %93 = arith.subf %89, %92 : vector<2x2x16x16xf32>
    %94 = math.exp %93 : vector<2x2x16x16xf32>
    %cst_45 = arith.constant dense<0.000000e+00> : vector<2x2x16xf32>
    %95 = vector.multi_reduction <add>, %94, %cst_45 [3] : vector<2x2x16x16xf32> to vector<2x2x16xf32>
    %96 = vector.shape_cast %95 : vector<2x2x16xf32> to vector<2x2x16x1xf32>
    %97 = vector.broadcast %96 : vector<2x2x16x1xf32> to vector<2x2x16x16xf32>
    %98 = arith.divf %94, %97 : vector<2x2x16x16xf32>
    %99 = vector.shape_cast %98 : vector<2x2x16x16xf32> to vector<2x32x16xf32>
    %100 = arith.truncf %99 : vector<2x32x16xf32> to vector<2x32x16xbf16>
    "tpu.trace_start"() <{level = 10 : i32, message = "gqk,gkd->gqd"}> : () -> ()
    %cst_46 = arith.constant dense<0.000000e+00> : vector<2x32x16xf32>
    %101 = tpu.matmul %100, %81, %cst_46 {dimension_numbers = #tpu.dot_dimension_numbers<[2], [1], [1], [2], [0, 0, 0, 1, 1, 2], [0], [0]>} : vector<2x32x16xbf16>, vector<2x16x16xbf16>, vector<2x32x16xf32> -> vector<2x32x16xf32>
    "tpu.trace_stop"() : () -> ()
    %102 = vector.shape_cast %101 : vector<2x32x16xf32> to vector<4x16x16xf32>
    %103 = tpu.transpose %102, [1, 0, 2] : vector<4x16x16xf32> -> vector<16x4x16xf32>
    %104 = vector.shape_cast %103 : vector<16x4x16xf32> to vector<16x64xf32>
    %c0_47 = arith.constant 0 : index
    %c0_48 = arith.constant 0 : index
    %c0_49 = arith.constant 0 : index
    %105 = vector.load %arg17[%c0_47, %c0_48, %c0_49] : memref<1x1x64xf32, #tpu.memory_space<vmem>>, vector<1x1x64xf32>
    %106 = vector.shape_cast %105 : vector<1x1x64xf32> to vector<1x64xf32>
    %107 = vector.broadcast %106 : vector<1x64xf32> to vector<16x64xf32>
    %108 = arith.mulf %104, %107 : vector<16x64xf32>
    %109 = arith.truncf %108 : vector<16x64xf32> to vector<16x64xbf16>
    %c0_50 = arith.constant 0 : index
    %c0_51 = arith.constant 0 : index
    %110 = vector.load %arg16[%c0_50, %c0_51] : memref<64x64xbf16, #tpu.memory_space<vmem>>, vector<64x64xbf16>
    %cst_52 = arith.constant dense<0.000000e+00> : vector<16x64xf32>
    %111 = tpu.matmul %109, %110, %cst_52 {dimension_numbers = #tpu.dot_dimension_numbers<[1], [0], [0], [1], [0, 0, 1, 1], [], []>} : vector<16x64xbf16>, vector<64x64xbf16>, vector<16x64xf32> -> vector<16x64xf32>
    %c0_53 = arith.constant 0 : index
    %c0_54 = arith.constant 0 : index
    %c0_55 = arith.constant 0 : index
    %112 = vector.load %arg18[%c0_53, %c0_54, %c0_55] : memref<1x1x64xf32, #tpu.memory_space<vmem>>, vector<1x1x64xf32>
    %113 = vector.shape_cast %112 : vector<1x1x64xf32> to vector<1x64xf32>
    %114 = vector.broadcast %113 : vector<1x64xf32> to vector<16x64xf32>
    %115 = arith.mulf %111, %114 : vector<16x64xf32>
    %116 = arith.addf %1, %115 : vector<16x64xf32>
    %c0_56 = arith.constant 0 : index
    %c0_57 = arith.constant 0 : index
    %c0_58 = arith.constant 0 : index
    %c0_59 = arith.constant 0 : index
    %117 = vector.load %arg19[%c0_56, %c0_57, %c0_58, %c0_59] : memref<1x1x16x64xf32, #tpu.memory_space<vmem>>, vector<1x1x16x64xf32>
    %118 = vector.shape_cast %117 : vector<1x1x16x64xf32> to vector<16x64xf32>
    %119 = vector.shape_cast %116 : vector<16x64xf32> to vector<1x1x16x64xf32>
    tpu.vector_store %arg19[%c0_56, %c0_57, %c0_58, %c0_59], %119 {strides = array<i32>} : memref<1x1x16x64xf32, #tpu.memory_space<vmem>>, vector<1x1x16x64xf32>,
    return
  }
  func.func @transform_0(%arg0: i32, %arg1: i32) -> (i32, i32, i32, i32) {
    %c0_i32 = arith.constant 0 : i32
    %c0_i32_0 = arith.constant 0 : i32
    %c0_i32_1 = arith.constant 0 : i32
    return %arg0, %arg1, %c0_i32, %c0_i32_0 : i32, i32, i32, i32
  }
  func.func @transform_1(%arg0: i32, %arg1: i32) -> (i32, i32) {
    %c0_i32 = arith.constant 0 : i32
    %c0_i32_0 = arith.constant 0 : i32
    %c0_i32_1 = arith.constant 0 : i32
    return %c0_i32, %c0_i32_0 : i32, i32
  }
  func.func @transform_2(%arg0: i32, %arg1: i32) -> (i32, i32) {
    %c0_i32 = arith.constant 0 : i32
    %c0_i32_0 = arith.constant 0 : i32
    %c0_i32_1 = arith.constant 0 : i32
    return %c0_i32, %c0_i32_0 : i32, i32
  }
  func.func @transform_3(%arg0: i32, %arg1: i32) -> (i32, i32) {
    %c0_i32 = arith.constant 0 : i32
    %c0_i32_0 = arith.constant 0 : i32
    %c0_i32_1 = arith.constant 0 : i32
    return %c0_i32, %c0_i32_0 : i32, i32
  }
  func.func @transform_4(%arg0: i32, %arg1: i32) -> (i32, i32) {
    %c0_i32 = arith.constant 0 : i32
    %c0_i32_0 = arith.constant 0 : i32
    %c0_i32_1 = arith.constant 0 : i32
    return %c0_i32, %c0_i32_0 : i32, i32
  }
  func.func @transform_5(%arg0: i32, %arg1: i32) -> (i32, i32) {
    %c0_i32 = arith.constant 0 : i32
    %c0_i32_0 = arith.constant 0 : i32
    %c0_i32_1 = arith.constant 0 : i32
    return %c0_i32, %c0_i32_0 : i32, i32
  }
  func.func @transform_6(%arg0: i32, %arg1: i32) -> (i32, i32, i32) {
    %c0_i32 = arith.constant 0 : i32
    %c0_i32_0 = arith.constant 0 : i32
    %c0_i32_1 = arith.constant 0 : i32
    return %arg1, %c0_i32, %c0_i32_0 : i32, i32, i32
  }
  func.func @transform_7(%arg0: i32, %arg1: i32) -> (i32, i32, i32) {
    %c0_i32 = arith.constant 0 : i32
    %c0_i32_0 = arith.constant 0 : i32
    %c0_i32_1 = arith.constant 0 : i32
    return %arg1, %c0_i32, %c0_i32_0 : i32, i32, i32
  }
  func.func @transform_8(%arg0: i32, %arg1: i32) -> (i32, i32) {
    %c0_i32 = arith.constant 0 : i32
    %c0_i32_0 = arith.constant 0 : i32
    %c0_i32_1 = arith.constant 0 : i32
    return %c0_i32, %c0_i32_0 : i32, i32
  }
  func.func @transform_9(%arg0: i32, %arg1: i32) -> (i32, i32, i32) {
    %c0_i32 = arith.constant 0 : i32
    %c0_i32_0 = arith.constant 0 : i32
    %c0_i32_1 = arith.constant 0 : i32
    return %arg1, %c0_i32, %c0_i32_0 : i32, i32, i32
  }
  func.func @transform_10(%arg0: i32, %arg1: i32) -> (i32, i32, i32) {
    %c0_i32 = arith.constant 0 : i32
    %c0_i32_0 = arith.constant 0 : i32
    %c0_i32_1 = arith.constant 0 : i32
    return %arg1, %c0_i32, %c0_i32_0 : i32, i32, i32
  }
  func.func @transform_11(%arg0: i32, %arg1: i32) -> (i32, i32) {
    %c0_i32 = arith.constant 0 : i32
    %c0_i32_0 = arith.constant 0 : i32
    %c0_i32_1 = arith.constant 0 : i32
    return %c0_i32, %c0_i32_0 : i32, i32
  }
  func.func @transform_12(%arg0: i32, %arg1: i32) -> (i32, i32, i32) {
    %c0_i32 = arith.constant 0 : i32
    %c0_i32_0 = arith.constant 0 : i32
    %c0_i32_1 = arith.constant 0 : i32
    return %arg1, %c0_i32, %c0_i32_0 : i32, i32, i32
  }
  func.func @transform_13(%arg0: i32, %arg1: i32) -> (i32, i32, i32) {
    %c0_i32 = arith.constant 0 : i32
    %c0_i32_0 = arith.constant 0 : i32
    %c0_i32_1 = arith.constant 0 : i32
    return %arg1, %c0_i32, %c0_i32_0 : i32, i32, i32
  }
  func.func @transform_14(%arg0: i32, %arg1: i32) -> (i32, i32) {
    %c0_i32 = arith.constant 0 : i32
    %c0_i32_0 = arith.constant 0 : i32
    %c0_i32_1 = arith.constant 0 : i32
    return %c0_i32, %c0_i32_0 : i32, i32
  }
  func.func @transform_15(%arg0: i32, %arg1: i32) -> (i32, i32, i32) {
    %c0_i32 = arith.constant 0 : i32
    %c0_i32_0 = arith.constant 0 : i32
    %c0_i32_1 = arith.constant 0 : i32
    return %arg1, %c0_i32, %c0_i32_0 : i32, i32, i32
  }
  func.func @transform_16(%arg0: i32, %arg1: i32) -> (i32, i32, i32) {
    %c0_i32 = arith.constant 0 : i32
    %c0_i32_0 = arith.constant 0 : i32
    %c0_i32_1 = arith.constant 0 : i32
    return %arg1, %c0_i32, %c0_i32_0 : i32, i32, i32
  }
  func.func @transform_17(%arg0: i32, %arg1: i32) -> (i32, i32, i32, i32) {
    %c0_i32 = arith.constant 0 : i32
    %c0_i32_0 = arith.constant 0 : i32
    %c0_i32_1 = arith.constant 0 : i32
    return %arg1, %arg0, %c0_i32, %c0_i32_0 : i32, i32, i32, i32
  }
}

</mosaic_0001>

<bundles_post_ra>
// kernel: tpu_custom_call.1
= control target key start
LH: loop header
LB: loop body
LE: loop exit
PB: predicated region body
PF: predicated region fallthrough
CT: control target
= control target key end

     0   :  { %s5850_s0 = inlined_call_operand.vmem [shape: f32[2,2,16,64], index: 0, kind: input, shape index: {}]   ;;  %s5851_s1 = inlined_call_operand.hbm [shape: f32[16,16], index: 1, kind: input, shape index: {}]   ;;  %s5852_s2 = inlined_call_operand.hbm [shape: f32[1,64], index: 2, kind: input, shape index: {}]   ;;  %s5853_s3 = inlined_call_operand.hbm [shape: f32[16,16], index: 3, kind: input, shape index: {}]   ;;  %s5854_s4 = inlined_call_operand.hbm [shape: f32[16,16], index: 4, kind: input, shape index: {}]   ;;  %s5855_s5 = inlined_call_operand.vmem [shape: bf16[64,64], index: 5, kind: input, shape index: {}]   ;;  %s5856_s6 = inlined_call_operand.vmem [shape: f32[2,1,64], index: 6, kind: input, shape index: {}]   ;;  %s5857_s7 = inlined_call_operand.hbm [shape: f32[2,1,64], index: 7, kind: input, shape index: {}]   ;;  %s5858_s8 = inlined_call_operand.vmem [shape: bf16[64,32], index: 8, kind: input, shape index: {}]   ;;  %s5859_s9 = inlined_call_operand.hbm [shape: f32[2,1,64], index: 9, kind: input, shape index: {}]   ;;  %s5860_s10 = inlined_call_operand.vmem [shape: f32[2,1,32], index: 10, kind: input, shape index: {}]   ;;  %s5861_s11 = inlined_call_operand.vmem [shape: bf16[64,32], index: 11, kind: input, shape index: {}]   ;;  %s5862_s12 = inlined_call_operand.vmem [shape: f32[2,1,64], index: 12, kind: input, shape index: {}]   ;;  %s5863_s13 = inlined_call_operand.vmem [shape: f32[2,1,32], index: 13, kind: input, shape index: {}]   ;;  %s5864_s14 = inlined_call_operand.vmem [shape: bf16[64,64], index: 14, kind: input, shape index: {}]   ;;  %s5865_s15 = inlined_call_operand.vmem [shape: f32[2,1,64], index: 15, kind: input, shape index: {}]   ;;  %s5866_s16 = inlined_call_operand.vmem [shape: f32[2,1,64], index: 16, kind: input, shape index: {}]   ;;  %s5867_s17 = inlined_call_operand.hbm [shape: f32[2,2,16,64], index: 17, kind: output, shape index: {}]  }
   0x1   :  { %5924 = sst [smem:[#allocation54_spill]] %s5850_s0 }
   0x2   :  { %5925 = sst [smem:[#allocation55_spill]] %s5851_s1 }
   0x3   :  { %5926 = sst [smem:[#allocation56_spill]] %s5852_s2 }
   0x4   :  { %5927 = sst [smem:[#allocation57_spill]] %s5855_s5 }
   0x5   :  { %5928 = sst [smem:[#allocation58_spill]] %s5856_s6 }
   0x6   :  { %5929 = sst [smem:[#allocation59_spill]] %s5857_s7 }
   0x7   :  { %5930 = sst [smem:[#allocation60_spill]] %s5858_s8 }
   0x8   :  { %5931 = sst [smem:[#allocation61_spill]] %s5860_s10 }
   0x9   :  { %5932 = sst [smem:[#allocation62_spill]] %s5861_s11 }
   0xa   :  { %5933 = sst [smem:[#allocation63_spill]] %s5862_s12 }
   0xb   :  { %5934 = sst [smem:[#allocation64_spill]] %s5863_s13 }
   0xc   :  { %5935 = sst [smem:[#allocation65_spill]] %s5864_s14 }
   0xd   :  { %5936 = sst [smem:[#allocation66_spill]] %s5865_s15 }
   0xe   :  { %5937 = sst [smem:[#allocation67_spill]] %s5866_s16 }
   0xf   :  { %5938 = sst [smem:[#allocation68_spill]] %s5867_s17 }
  0x10   :  { %22 = vsyncpa [#allocation3], 0 }
  0x11   :  { %23 = vsyncpa [#allocation6], 0 }
  0x12   :  { %24 = vsyncpa [#allocation9], 0 }
  0x13   :  { %25 = vsyncpa [#allocation4], 0 }
  0x14   :  { %27 = vsyncpa [#allocation4 + $0x1], 0  ;;  %s4489_s24 = smov 0   ;;  %s4491_s25 = smov 0  }
  0x15   :  { %s4493_s26 = smov 0   ;;  %s4495_s27 = smov 0  }
  0x16   :  { %s4497_s28 = smov 0   ;;  %s4499_s29 = smov 0  }
  0x17   :  { %s4501_s0 = smov 0   ;;  %s4503_s30 = smov 0  }
  0x18   :  { %s4505_s18 = smov 0   ;;  %s4507_s19 = smov 0  }
  0x19   :  { %s4509_s1 = smov 0  }
  0x1a LB: > { %5939 = sst [smem:[#allocation18_spill]] %s4334_s24  ;;  %s4543_s20 = sadd.s32 4294967295, %s4374_s1   ;;  %s4374_s1 = sphi %s4509_s1, %s33_s1   ;;  %s4370_s19 = sphi %s4507_s19, %s6054_s19   ;;  %s4366_s18 = sphi %s4505_s18, %s6061_s18   ;;  %s4362_s30 = sphi %s4503_s30, %s6052_s30   ;;  %s4358_s0 = sphi %s4501_s0, %s6060_s0   ;;  %s4354_s29 = sphi %s4499_s29, %s6059_s29   ;;  %s4350_s28 = sphi %s4497_s28, %s6058_s28   ;;  %s4346_s27 = sphi %s4495_s27, %s6057_s27   ;;  %s4342_s26 = sphi %s4493_s26, %s6050_s26   ;;  %s4338_s25 = sphi %s4491_s25, %s6056_s25   ;;  %s4334_s24 = sphi %s4489_s24, %s6055_s24  }
  0x1b   : > { %5940 = sst [smem:[#allocation19_spill]] %s4342_s26  ;;  %p224_p0 = scmp.ne.s32.totalorder %s4350_s28, %s4346_s27 }
  0x1c   : > { %5941 = sst [smem:[#allocation20_spill]] %s4358_s0  ;;  %p5873_p1 = scmp.eq.s32.totalorder %s4543_s20, 0 }
  0x1d   : > { %5942 = sst [smem:[#allocation21_spill]] %s4362_s30  ;;  %p3652_p3 = scmp.ge.s32.totalorder %s4374_s1, 1 }
  0x1e   : > { %5943 = sst [smem:[#allocation22_spill]] %s4370_s19  ;;  %p482_p4 = scmp.lt.s32.totalorder %s4374_s1, 5 }
  0x1f   : > { %p4552_p5 = por %p5873_p1, %p224_p0  ;;  %s4376_s23 = smov [#allocation2]  }
  0x20   : > { %p4556_p6 = pnand %p3652_p3, %p482_p4  ;;  %s494_s17 = sshll.u32 %s4376_s23, 4  ;;  %s495_s17 = int_to_ptr.vmem [resolvable:$true] %s494_s17 }
  0x21   : > { %s5944_s21 = scalar_select %p4552_p5, 1, 0 }
  0x22   : > { %s5946_s22 = scalar_select %p4556_p6, 1, 0 }
  0x23   : > { %5945 = sst [smem:[#allocation23_spill]] %s5944_s21  ;;  %p3868_p7 = pneg %p4556_p6 }
  0x24   : > { %s4377_s16 = smov [#allocation5]   ;;  %s5948_s10 = sld [smem:[#allocation55_spill]] }
  0x25   : > { %p4564_p8 = pnand %p3868_p7, %p5873_p1  ;;  %s508_s15 = sshll.u32 %s4377_s16, 4  ;;  %s4568_s15 = int_to_ptr.vmem [resolvable:$true] %s508_s15 }
  0x27   : > { %s5947_s27 = scalar_select %p4564_p8, 1, 0 }
  0x28   : > { %p4578_p10 = pneg %p4564_p8 }
  0x2a   : > { %s4068_s12 = scalar_lea.hbm %s5948_s10, 256 }
  0x2b   : > { %p4069_p9 = scmp.ne.s32.totalorder %s5948_s10, %s4068_s12  ;;  %p4075_p13 = scmp.lt.u32.totalorder %s4068_s12, %s5948_s10 }
  0x2d   : > { %p4071_p11 = pnand %p4578_p10, %p4069_p9 }
  0x2f   : > { %p4072_p12 = pneg %p4071_p11 }
  0x31   : > { %p4077_p0 = pnand %p4075_p13, %p4072_p12 }
  0x33   : > { %4080 = shalt.err (!%p4077_p0)
}
  0x34   : > { %s4081_s13 = scalar_lea.vmem %s495_s17, 256  ;;  %p4089_p1 = scmp.lt.s32.totalorder %s495_s17, %s495_s17 }
  0x35   : > { %p4082_p3 = scmp.ne.s32.totalorder %s495_s17, %s4081_s13  ;;  %p4090_p2 = scmp.lt.s32.totalorder %s4081_s13, %s4081_s13 }
  0x37   : > { %p4084_p4 = pnand %p4082_p3, %p4578_p10  ;;  %p4091_p5 = por %p4090_p2, %p4089_p1 }
  0x39   : > { %p4085_p7 = pneg %p4084_p4 }
  0x3b   : > { %p4092_p6 = pnand %p4091_p5, %p4085_p7 }
  0x3d   : > { %4095 = shalt.err (!%p4092_p6)
}
  0x3e   : > { %s5881_s6 = smov 128   ;;  %s5883_s11 = smov 8  }
  0x3f   : > { %3871 = dma.hbm_to_vmem [thread:$0]  (!%p4564_p8), %s5948_s10, 256, %s495_s17, [#allocation3], %s5881_s6, %s5881_s6, %s5883_s11  }
  0x40   : > { %s5950_s2 = sld [smem:[#allocation56_spill]] }
  0x46   : > { %s4096_s5 = scalar_lea.hbm %s5950_s2, 16 }
  0x47   : > { %p4097_p1 = scmp.ne.s32.totalorder %s5950_s2, %s4096_s5  ;;  %p4103_p6 = scmp.lt.u32.totalorder %s4096_s5, %s5950_s2 }
  0x49   : > { %p4099_p2 = pnand %p4097_p1, %p4578_p10 }
  0x4b   : > { %p4100_p5 = pneg %p4099_p2 }
  0x4d   : > { %p4105_p9 = pnand %p4103_p6, %p4100_p5 }
  0x4f   : > { %4108 = shalt.err (!%p4105_p9)
}
  0x50   : > { %s4109_s17 = scalar_lea.vmem %s4568_s15, 16  ;;  %s4116_s0 = scalar_lea.vmem %s4568_s15, 32 }
  0x51   : > { %p4110_p11 = scmp.ne.s32.totalorder %s4568_s15, %s4109_s17  ;;  %p4117_p0 = scmp.lt.s32.totalorder %s4568_s15, %s4568_s15 }
  0x52   : > { %p4118_p3 = scmp.lt.s32.totalorder %s4116_s0, %s4109_s17 }
  0x53   : > { %p4112_p12 = pnand %p4110_p11, %p4578_p10 }
  0x54   : > { %p4119_p4 = por %p4118_p3, %p4117_p0 }
  0x55   : > { %p4113_p13 = pneg %p4112_p12 }
  0x57   : > { %p4120_p7 = pnand %p4119_p4, %p4113_p13 }
  0x59   : > { %4123 = shalt.err (!%p4120_p7)
}
  0x5a   : > { %3874 = dma.hbm_to_vmem [thread:$0]  (!%p4564_p8), %s5950_s2, 16, %s4568_s15, [#allocation6]  }
  0x5b   : > { %s3651_s21 = sadd.s32 4294967294, %s4374_s1   ;;  %s42_s8 = sadd.s32 1, %s4366_s18 }
  0x5c   : > { %s45_s12 = sadd.s32 1, %s4370_s19  ;;  %p43_p1 = scmp.ge.s32.totalorder %s42_s8, 2 }
  0x5d   : > { %s211_s14 = sadd.s32 1, %s4354_s29  ;;  %p218_p2 = scmp.ne.s32.totalorder %s4354_s29, %s4350_s28 }
  0x5e   : > { %p219_p5 = scmp.eq.s32.totalorder %s4374_s1, 0  ;;  %s6063_s8 = smov (%p43_p1, %s42_s8), 0 }
  0x5f   : > { %5951 = sst [smem:[#allocation24_spill]] %s6063_s8  ;;  %s6065_s12 = smov (!%p43_p1, %s45_s12), %s4370_s19 }
  0x60   : > { %s208_s16 = ssub.s32 %s4366_s18, %s6063_s8  ;;  %p4633_p6 = por %p219_p5, %p218_p2 }
  0x61   : > { %p47_p9 = scmp.ge.s32.totalorder %s6065_s12, 2  ;;  %p209_p11 = scmp.eq.s32.totalorder %s208_s16, 0 }
  0x62   : > { %s458_s13 = sadd.s32 1, %s4342_s26  ;;  %p468_p12 = scmp.ne.s32.totalorder %s4342_s26, %s4338_s25 }
  0x63   : > { %s6067_s12 = smov (%p47_p9, %s6065_s12), 0  ;;  %p5955_p13 = scmp.eq.s32.totalorder %s4543_s20, 3 }
  0x64   : > { %5953 = sst [smem:[#allocation25_spill]] %s6067_s12  ;;  %s454_s0 = ssub.s32 %s4370_s19, %s6067_s12 }
  0x65   : > { %s4643_s17 = scalar_select %p209_p11, %s4354_s29, %s211_s14  }
  0x66   : > { %p4649_p0 = por %p5955_p13, %p468_p12  ;;  %s455_s30 = sor.u32 %s454_s0, %s208_s16 }
  0x67   : > { %5954 = sst [smem:[#allocation26_spill]] %s4643_s17  ;;  %p474_p3 = scmp.ne.s32.totalorder %s4338_s25, %s4334_s24 }
  0x68   : > { %s5956_s5 = scalar_select %p4649_p0, 1, 0 }
  0x69   : > { %p456_p4 = scmp.eq.s32.totalorder %s455_s30, 0  ;;  %p475_p7 = scmp.eq.s32.totalorder %s3651_s21, 3 }
  0x6a   : > { %p3896_p1 = scmp.lt.s32.totalorder %s4374_s1, 4  ;;  %s575_s6 = sand.u32 1, %s4374_s1  }
  0x6b   : > { %s4658_s11 = scalar_select %p456_p4, %s4342_s26, %s458_s13  }
  0x6c   : > { %p4660_p2 = por %p475_p7, %p474_p3  ;;  %s5889_s14 = sand.u32 1, %s4354_s29  }
  0x6d   : > { %5957 = sst [smem:[#allocation27_spill]] %s4658_s11  ;;  %s5890_s10 = sshll.u32 %s4366_s18, 4 }
  0x6e   : > { %s5958_s2 = scalar_select %p4660_p2, 1, 0 }
  0x6f   : > { %s5960_s7 = sld [smem:[#allocation59_spill]]  ;;  %s578_s21 = scalar_lea.vmem [#allocation10], %s5889_s14 }
  0x70   : > { %5959 = sst [smem:[#allocation28_spill]] %s5958_s2  ;;  %s585_s16 = sshll.u32 %s578_s21, 4  ;;  %s4681_s16 = int_to_ptr.vmem [resolvable:$true] %s585_s16 }
  0x71   : > { %p4677_p5 = pnand %p3896_p1, %p4633_p6  ;;  %s4380_s0 = smov [#allocation7]  }
  0x72   : > { %s4683_s8 = sshll.u32 %s4380_s0, 4  ;;  %s4685_s12 = scalar_lea.sflag [#allocation3], %s575_s6  ;;  %s519_s8 = int_to_ptr.vmem [resolvable:$true] %s4683_s8 }
  0x73   : > { %s5961_s13 = scalar_select %p4677_p5, 1, 0 }
  0x74   : > { %p5894_p11 = pneg %p4677_p5 }
  0x75   : > { %s4671_s19 = scalar_lea.hbm %s5960_s7, %s5890_s10  ;;  %s4129_s14 = scalar_lea.hbm %s5960_s7, 32 }
  0x76   : > { %s4124_s30 = scalar_lea.hbm %s4671_s19, 16  ;;  %p4130_p13 = scmp.lt.u32.totalorder %s4671_s19, %s5960_s7 }
  0x77   : > { %p4125_p9 = scmp.ne.s32.totalorder %s4671_s19, %s4124_s30  ;;  %p4131_p3 = scmp.lt.u32.totalorder %s4129_s14, %s4124_s30 }
  0x78   : > { %p4133_p7 = scmp.lt.u32.totalorder %s4124_s30, %s4671_s19 }
  0x79   : > { %p4127_p12 = pnand %p5894_p11, %p4125_p9  ;;  %p4132_p4 = por %p4131_p3, %p4130_p13 }
  0x7b   : > { %p4128_p6 = pneg %p4127_p12  ;;  %p4134_p1 = por %p4133_p7, %p4132_p4 }
  0x7d   : > { %p4135_p2 = pnand %p4134_p1, %p4128_p6 }
  0x7f   : > { %4138 = shalt.err (!%p4135_p2)
}
  0x80   : > { %s4139_s6 = scalar_lea.vmem %s4681_s16, 16  ;;  %s4381_s0 = smov [#allocation10]  }
  0x81   : > { %p4140_p9 = scmp.ne.s32.totalorder %s4681_s16, %s4139_s6  ;;  %s4144_s15 = sshll.u32 %s4381_s0, 4  ;;  %s4145_s15 = int_to_ptr.vmem [resolvable:$false] %s4144_s15 }
  0x82   : > { %s4146_s10 = scalar_lea.vmem %s4145_s15, 32  ;;  %p4147_p8 = scmp.lt.s32.totalorder %s4681_s16, %s4145_s15 }
  0x83   : > { %p4142_p12 = pnand %p4140_p9, %p5894_p11  ;;  %p4148_p13 = scmp.lt.s32.totalorder %s4146_s10, %s4139_s6 }
  0x85   : > { %p4143_p0 = pneg %p4142_p12  ;;  %p4149_p3 = por %p4148_p13, %p4147_p8 }
  0x87   : > { %p4150_p4 = pnand %p4149_p3, %p4143_p0 }
  0x89   : > { %4153 = shalt.err (!%p4150_p4)
}
  0x8a   : > { %3884 = dma.hbm_to_vmem [thread:$0]  (!%p4677_p5), %s4671_s19, 16, %s4681_s16, %s4685_s12  }
  0x8b   : > { %s4154_s30 = scalar_lea.hbm %s5853_s3, 256 }
  0x8c   : > { %p4155_p2 = scmp.ne.s32.totalorder %s5853_s3, %s4154_s30  ;;  %p4161_p6 = scmp.lt.u32.totalorder %s4154_s30, %s5853_s3 }
  0x8e   : > { %p4157_p8 = pnand %p4155_p2, %p4578_p10 }
  0x90   : > { %p4158_p0 = pneg %p4157_p8 }
  0x92   : > { %p4163_p7 = pnand %p4161_p6, %p4158_p0 }
  0x94   : > { %4166 = shalt.err (!%p4163_p7)
}
  0x95   : > { %s4167_s10 = scalar_lea.vmem %s519_s8, 256  ;;  %p4175_p13 = scmp.lt.s32.totalorder %s519_s8, %s519_s8 }
  0x96   : > { %p4168_p1 = scmp.ne.s32.totalorder %s519_s8, %s4167_s10  ;;  %p4176_p3 = scmp.lt.s32.totalorder %s4167_s10, %s4167_s10 }
  0x98   : > { %p4170_p9 = pnand %p4168_p1, %p4578_p10  ;;  %p4177_p4 = por %p4176_p3, %p4175_p13 }
  0x9a   : > { %p4171_p12 = pneg %p4170_p9 }
  0x9c   : > { %p4178_p11 = pnand %p4177_p4, %p4171_p12 }
  0x9e   : > { %4181 = shalt.err (!%p4178_p11)
}
  0x9f   : > { %p5962_p2 = scmp.ne.s32.totalorder %s5947_s27, 0  ;;  %s5963_s19 = smov 8  }
  0xa0   : > { %s5964_s16 = smov 128   ;;  %s4382_s30 = smov [#allocation8]  }
  0xa1   : > { %3877 = dma.hbm_to_vmem [thread:$0]  (!%p5962_p2), %s5853_s3, 256, %s519_s8, [#allocation6], %s5964_s16, %s5964_s16, %s5963_s19  }
  0xa2   : > { %s531_s21 = sshll.u32 %s4382_s30, 4  ;;  %s5965_s0 = sshll.u32 %s4366_s18, 4  ;;  %s532_s21 = int_to_ptr.vmem [resolvable:$true] %s531_s21 }
  0xa3   : > { %s4740_s10 = scalar_lea.hbm %s5859_s9, %s5965_s0  ;;  %s4182_s26 = scalar_lea.hbm %s5854_s4, 256 }
  0xa4   : > { %p4183_p11 = scmp.ne.s32.totalorder %s5854_s4, %s4182_s26  ;;  %p4189_p6 = scmp.lt.u32.totalorder %s4182_s26, %s5854_s4 }
  0xa6   : > { %p4185_p8 = pnand %p4183_p11, %p4578_p10 }
  0xa8   : > { %p4186_p0 = pneg %p4185_p8 }
  0xaa   : > { %p4191_p7 = pnand %p4189_p6, %p4186_p0 }
  0xac   : > { %4194 = shalt.err (!%p4191_p7)
}
  0xad   : > { %s4195_s14 = scalar_lea.vmem %s532_s21, 256  ;;  %p4203_p13 = scmp.lt.s32.totalorder %s532_s21, %s532_s21 }
  0xae   : > { %p4196_p1 = scmp.ne.s32.totalorder %s532_s21, %s4195_s14  ;;  %p4204_p3 = scmp.lt.s32.totalorder %s4195_s14, %s4195_s14 }
  0xb0   : > { %p4198_p9 = pnand %p4196_p1, %p4578_p10  ;;  %p4205_p4 = por %p4204_p3, %p4203_p13 }
  0xb2   : > { %p4199_p12 = pneg %p4198_p9 }
  0xb4   : > { %p4206_p5 = pnand %p4205_p4, %p4199_p12 }
  0xb6   : > { %4209 = shalt.err (!%p4206_p5)
}
  0xb7   : > { %3880 = dma.hbm_to_vmem [thread:$0]  (!%p5962_p2), %s5854_s4, 256, %s532_s21, [#allocation9], %s5964_s16, %s5964_s16, %s5963_s19  }
  0xb8   : > { %s5966_s24 = sand.u32 1, %s4354_s29   ;;  %s4210_s11 = scalar_lea.hbm %s4740_s10, 16 }
  0xb9   : > { %s595_s26 = scalar_lea.vmem [#allocation11], %s5966_s24  ;;  %p4211_p10 = scmp.ne.s32.totalorder %s4740_s10, %s4210_s11 }
  0xba   : > { %s602_s23 = sshll.u32 %s595_s26, 4  ;;  %p5967_p5 = scmp.ne.s32.totalorder %s5961_s13, 0  ;;  %s603_s23 = int_to_ptr.vmem [resolvable:$true] %s602_s23 }
  0xbb   : > { %s4215_s0 = scalar_lea.hbm %s5859_s9, 32  ;;  %p4216_p6 = scmp.lt.u32.totalorder %s4740_s10, %s5859_s9 }
  0xbc   : > { %p5968_p11 = pneg %p5967_p5  ;;  %p4217_p7 = scmp.lt.u32.totalorder %s4215_s0, %s4210_s11 }
  0xbd   : > { %p4219_p1 = scmp.lt.u32.totalorder %s4210_s11, %s4740_s10 }
  0xbe   : > { %p4213_p8 = pnand %p4211_p10, %p5968_p11  ;;  %p4218_p2 = por %p4217_p7, %p4216_p6 }
  0xc0   : > { %p4214_p0 = pneg %p4213_p8  ;;  %p4220_p9 = por %p4219_p1, %p4218_p2 }
  0xc2   : > { %p4221_p12 = pnand %p4220_p9, %p4214_p0 }
  0xc4   : > { %4224 = shalt.err (!%p4221_p12)
}
  0xc5   : > { %s4225_s19 = scalar_lea.vmem %s603_s23, 16  ;;  %p5969_p3 = pmov %p5968_p11 }
  0xc6   : > { %p4226_p13 = scmp.ne.s32.totalorder %s603_s23, %s4225_s19  ;;  %s4383_s16 = smov [#allocation11]  }
  0xc7   : > { %s4230_s21 = sshll.u32 %s4383_s16, 4  ;;  %s4231_s21 = int_to_ptr.vmem [resolvable:$false] %s4230_s21 }
  0xc8   : > { %p4228_p4 = pnand %p4226_p13, %p5969_p3  ;;  %s4232_s8 = scalar_lea.vmem %s4231_s21, 32 }
  0xc9   : > { %p4233_p11 = scmp.lt.s32.totalorder %s603_s23, %s4231_s21  ;;  %p4234_p8 = scmp.lt.s32.totalorder %s4232_s8, %s4225_s19 }
  0xca   : > { %p4229_p10 = pneg %p4228_p4 }
  0xcb   : > { %p4235_p6 = por %p4234_p8, %p4233_p11 }
  0xcd   : > { %p4236_p7 = pnand %p4235_p6, %p4229_p10 }
  0xcf   : > { %4239 = shalt.err (!%p4236_p7)
}
  0xd0   : > { %3887 = dma.hbm_to_vmem [thread:$0]  (!%p5967_p5), %s4740_s10, 16, %s603_s23, %s4685_s12  }
  0xd1   : > { %p5970_p0 = scmp.ne.s32.totalorder %s5946_s22, 0 }
  0xd3   : > { %641 = sbr.rel (%p5970_p0) target bundleno = 2212 (0x8a4), region = 88 }
  0xda   : > { %p5971_p2 = scmp.eq.s32.totalorder %s4543_s20, 0 }
  0xdc   : > { %4313 = dma.done.wait (%p5971_p2), [#allocation3], 256   ;;  %p5972_p1 = pmov %p5971_p2 }
  0xde   : > { %4315 = vsyncadd (%p5972_p1), [#allocation3], 4294967040  ;;  %p5973_p9 = pmov %p5972_p1 }
  0xdf   : > { %p5974_p12 = pmov %p5972_p1 }
  0xe0   : > { %4317 = dma.done.wait (%p5973_p9), [#allocation6], 272  }
  0xe1   : > { %4319 = vsyncadd (%p5974_p12), [#allocation6], 4294967024  ;;  %p5975_p13 = pmov %p5972_p1 }
  0xe2   : > { %p5976_p5 = pmov %p5972_p1 }
  0xe3   : > { %4321 = dma.done.wait (%p5975_p13), [#allocation9], 256  }
  0xe4   : > { %4323 = vsyncadd (%p5976_p5), [#allocation9], 4294967040  ;;  %s5977_s22 = sld [smem:[#allocation23_spill]]  ;;  %s659_s13 = sand.u32 1, %s4543_s20  }
  0xe5   : > { %s661_s12 = sand.u32 1, %s4350_s28   ;;  %s660_s10 = scalar_lea.sflag [#allocation3], %s659_s13 }
  0xe6   : > { %s4803_s17 = scalar_lea.vmem [#allocation10], %s661_s12 }
  0xea   : > { %p5978_p3 = scmp.ne.s32.totalorder %s5977_s22, 0 }
  0xec   : > { %4325 = dma.done.wait (%p5978_p3), %s660_s10, 32  }
  0xed   : > { %4327 = vsyncadd (%p5978_p3), %s660_s10, 4294967264  ;;  %s5979_s14 = sld [smem:[#allocation21_spill]]  ;;  %s5980_s2 = sld [smem:[#allocation20_spill]]  ;;  %vm783_vm0 = vcmask 523264   ;;  %v5900_v7 = vmov 0.0   ;;  %vm4385_vm1 = vmmov 0   ;;  %v1101_v62 = vlaneseq }
  0xee   : > { %s5981_s0 = sld [smem:[#allocation54_spill]]  ;;  %s5982_s16 = sld [smem:[#allocation57_spill]]  ;;  %3772 = vmatprep.subr.bf16.mxu0 %v5900_v7  ;;  %3784 = vmatprep.subr.bf16.mxu1 %v5900_v7  ;;  %v3669_v23 = vld [vmem:[#allocation5] ss:$0 sm:$0xff]  ;;  %v3676_v44 = vld [vmem:[%s4803_s17] ss:$0 sm:$0xff] }
  0xef   : > { %s5983_s22 = sld [smem:[#allocation60_spill]]  ;;  %3780 = vmatprep.mubr.msk.bf16.mxu0 %vm4385_vm1, %v5900_v7  ;;  %3792 = vmatprep.mubr.msk.bf16.mxu1 %vm4385_vm1, %v5900_v7  ;;  %s5984_s13 = sld [smem:[#allocation58_spill]]  ;;  %v4389_v63 = vmov 1983009808   ;;  %vm1597_vm2 = vcmask 64512   ;;  %vm2680_vm3 = vcmask 130048  }
  0xf0   : > { %s5986_s19 = sld [smem:[#allocation63_spill]]  ;;  %s4388_s17 = smov 80   ;;  %vm3315_vm4 = vcmask 261120   ;;  %vm3318_vm5 = vcmask 392192  }
  0xf1   : > { %s4391_s27 = smov 8   ;;  %s4392_s30 = smov 120  }
  0xf2   : > { %s4396_s15 = smov 48   ;;  %s6041_s8 = sld [smem:[#allocation66_spill]] }
  0xf3   : > { %p751_p4 = scmp.lt.s32.totalorder %s5979_s14, 1  ;;  %p753_p10 = scmp.lt.s32.totalorder %s5980_s2, 1 }
  0xf4   : > { %v4010_v6 = vld [vmem:[%s5982_s16] sm:$0xff]   ;;  %v4012_v9 = vld [vmem:[%s5982_s16 + $0x8] sm:$0xff]   ;;  %v4014_v11 = vld [vmem:[%s5982_s16 + $0x10] sm:$0xff]   ;;  %p6045_p8 = scmp.ne.s32.totalorder %s5956_s5, 0 }
  0xf5   : > { %s752_s7 = scalar_select %p751_p4, %s5979_s14, 1  ;;  %v4011_v8 = vld [vmem:[%s5983_s22] sm:$0xff]   ;;  %3773 = vmatpush3.bf16.msra.mxu0 %v4010_v6  ;;  %v4013_v10 = vld [vmem:[%s5983_s22 + $0x8] sm:$0xff]   ;;  %v4015_v12 = vld [vmem:[%s5983_s22 + $0x10] sm:$0xff]  }
  0xf6   : > { %s4813_s24 = scalar_select %p753_p10, %s5980_s2, 1  ;;  %3785 = vmatpush3.bf16.msra.mxu1 %v4011_v8  ;;  %3774 = vmatprep.subr.bf16.mxu0 %v5900_v7  ;;  %v4016_v13 = vld [vmem:[%s5982_s16 + $0x18] sm:$0xff]  }
  0xf7   : > { %s3667_s20 = sshll.u32 %s752_s7, 2  ;;  %3786 = vmatprep.subr.bf16.mxu1 %v5900_v7  ;;  %v4017_v14 = vld [vmem:[%s5983_s22 + $0x18] sm:$0xff]   ;;  %s670_s7 = scalar_lea.vmem [#allocation11], %s661_s12 }
  0xf8   : > { %s3666_s26 = sshll.u32 %s4813_s24, 1  ;;  %s762_s10 = scalar_lea.vmem %s5984_s13, %s4813_s24  ;;  %v3677_v28 = vld [vmem:[%s670_s7] ss:$0 sm:$0xff] }
  0xf9   : > { %s757_s23 = sadd.s32 %s3667_s20, %s3666_s26  ;;  %3775 = vmatpush3.bf16.msra.mxu0 %v4012_v9  ;;  %v3670_v27 = vld [vmem:[%s762_s10] ss:$0 sm:$0xff]  ;;  %s768_s21 = scalar_lea.vmem %s5986_s19, %s4813_s24 }
  0xfa   : > { %s3668_s11 = sshll.u32 %s757_s23, 3  ;;  %3787 = vmatpush3.bf16.msra.mxu1 %v4013_v10  ;;  %3776 = vmatprep.subr.bf16.mxu0 %v5900_v7  ;;  %s5985_s23 = sld [smem:[#allocation62_spill]]  ;;  %v3684_v40 = vld [vmem:[%s768_s21] ss:$0 sm:$0xff] }
  0xfb   : > { %s4819_s6 = scalar_lea.vmem %s5981_s0, %s3668_s11  ;;  %3788 = vmatprep.subr.bf16.mxu1 %v5900_v7  ;;  %s5987_s20 = sld [smem:[#allocation61_spill]] }
  0xfc   : > { %v779_v0 = vld [vmem:[%s4819_s6] sm:$0xff]  ;;  %v780_v1 = vld [vmem:[%s4819_s6 + $0x8] sm:$0xff]  ;;  %s4386_s11 = smov 112   ;;  %s4387_s12 = smov 96  }
  0xfd   : > { %v781_v2 = vmul.f32 %v779_v0, %v779_v0  ;;  %v782_v3 = vmul.f32 %v780_v1, %v780_v1  ;;  %3777 = vmatpush3.bf16.msra.mxu0 %v4014_v11  ;;  %s6036_s19 = sld [smem:[#allocation64_spill]]  ;;  %s6040_s10 = sld [smem:[#allocation65_spill]] }
  0xfe   : > { %3789 = vmatpush3.bf16.msra.mxu1 %v4015_v12  ;;  %3778 = vmatprep.subr.bf16.mxu0 %v5900_v7  ;;  %s4395_s0 = smov 16   ;;  %s774_s13 = scalar_lea.vmem %s6041_s8, %s4813_s24 }
  0xff   : > { %v784_v4 = vsel %vm783_vm0, %v781_v2, 0.0  ;;  %v787_v5 = vsel %vm783_vm0, %v782_v3, 0.0  ;;  %3790 = vmatprep.subr.bf16.mxu1 %v5900_v7  ;;  %v4390_v3 = vmov 1934713408   ;;  %s748_s7 = sand.u32 1, %s4338_s25  }
 0x100   : > { %785 = vadd.xlane.f32.xlu0 %v784_v4  ;;  %v4018_v34 = vld [vmem:[%s5985_s23] sm:$0xff]   ;;  %v4019_v37 = vld [vmem:[%s5985_s23 + $0x8] sm:$0xff]   ;;  %v4020_v38 = vld [vmem:[%s5985_s23 + $0x10] sm:$0xff]   ;;  %v1352_v4 = vunpack.c.l.s4 %v4390_v3 }
 0x101   : > { %3779 = vmatpush3.bf16.msra.mxu0 %v4016_v13  ;;  %v4021_v39 = vld [vmem:[%s5985_s23 + $0x18] sm:$0xff]   ;;  %s765_s26 = scalar_lea.vmem %s5987_s20, %s4813_s24  ;;  %s3665_s20 = sshll.u32 %s748_s7, 4 }
 0x102   : > { %3791 = vmatpush3.bf16.msra.mxu1 %v4017_v14  ;;  %3796 = vmatprep.subr.bf16.mxu0 %v5900_v7  ;;  %v3683_v45 = vld [vmem:[%s765_s26] ss:$0 sm:$0xff]  ;;  %v1353_v6 = vunpack.c.0.s8 %v1352_v4  ;;  %s5788_s26 = scalar_lea.sflag [#allocation4], %s748_s7 }
 0x103   : > { %s771_s21 = scalar_lea.vmem %s6036_s19, %s4813_s24  ;;  %s750_s19 = scalar_lea.vmem [#allocation12], %s3665_s20 }
 0x104   : > { %788 = vadd.xlane.f32.xlu0 %v787_v5 }
 0x18d   : > { %v786_v15 = vpop.xlane.xlu0 %785 }
 0x18e   : > { %v791_v16 = vmul.f32 0.015625, %v786_v15 }
 0x190   : > { %v794_v17 = vadd.f32 1e-05, %v791_v16 }
 0x191   : > { %v789_v18 = vpop.xlane.xlu0 %788 }
 0x192   : > { %4030 = vrsqrt.f32 %v794_v17  ;;  %v792_v19 = vmul.f32 0.015625, %v789_v18 }
 0x194   : > { %v795_v20 = vadd.f32 1e-05, %v792_v19 }
 0x196   : > { %4032 = vrsqrt.f32 %v795_v20 }
 0x19c   : > { %v4031_v21 = vpop.eup %4030 }
 0x19d   : > { %v798_v22 = vmul.f32 %v4031_v21, %v779_v0  ;;  %v1320_v0 = vunpack.c.l.s4 %v4389_v63 }
 0x19f   : > { %v806_v26 = vmul.f32 %v3669_v23, %v798_v22  ;;  %v1321_v2 = vunpack.c.0.s8 %v1320_v0 }
 0x1a0   : > { %v4033_v24 = vpop.eup %4032 }
 0x1a1   : > { %v799_v25 = vmul.f32 %v4033_v24, %v780_v1  ;;  %v815_v30 = vmul.f32 %v3670_v27, %v806_v26  ;;  %v910_v32 = vmul.f32 %v3677_v28, %v806_v26  ;;  %v1005_v42 = vmul.f32 %v3684_v40, %v806_v26 }
 0x1a2   : > { %v4921_v1 = vshrl.u32 %v1101_v62, 7 }
 0x1a3   : > { %v807_v29 = vmul.f32 %v3669_v23, %v799_v25 }
 0x1a4   : > { %v4924_v5 = vsub.s32 %v1321_v2, %v4921_v1  ;;  %v4929_v11 = vsub.s32 %v1353_v6, %v4921_v1 }
 0x1a5   : > { %v816_v31 = vmul.f32 %v3670_v27, %v807_v29  ;;  %v911_v33 = vmul.f32 %v3677_v28, %v807_v29  ;;  %v1006_v41 = vmul.f32 %v3684_v40, %v807_v29 }
 0x1a6   : > { %5990 = vst [vmem:[#allocation31_spill] sm:$0xff] %v4929_v11 }
 0x1a7   : > { %v817_v35 = vpack.c.bf16 %v816_v31, %v815_v30  ;;  %v912_v36 = vpack.c.bf16 %v911_v33, %v910_v32  ;;  %v1007_v43 = vpack.c.bf16 %v1006_v41, %v1005_v42 }
 0x1a9   : > { %3781 = vmatmul.mubr.msk.bf16.vlgmr.msra.gmra.mrb[0].mxu0 %vm783_vm0, %v817_v35  ;;  %3793 = vmatmul.mubr.msk.bf16.vlgmr.msra.gmra.mrb[0].mxu1 %vm783_vm0, %v912_v36 }
 0x1aa   : > { %3797 = vmatpush3.bf16.msra.mxu0 %v4018_v34  ;;  %3804 = vmatprep.mubr.msk.bf16.mxu0 %vm4385_vm1, %v5900_v7 }
 0x1ab   : > { %3798 = vmatprep.subr.bf16.mxu0 %v5900_v7 }
 0x1ae   : > { %3799 = vmatpush3.bf16.msra.mxu0 %v4019_v37 }
 0x1af   : > { %3800 = vmatprep.subr.bf16.mxu0 %v5900_v7 }
 0x1b2   : > { %3801 = vmatpush3.bf16.msra.mxu0 %v4020_v38 }
 0x1b3   : > { %3802 = vmatprep.subr.bf16.mxu0 %v5900_v7 }
 0x1b6   : > { %3803 = vmatpush3.bf16.msra.mxu0 %v4021_v39 }
 0x1b7   : > { %3832 = vmatprep.subr.bf16.mxu0 %v5900_v7 }
 0x1b9   : > { %3805 = vmatmul.mubr.msk.bf16.vlgmr.msra.gmra.mrb[4].mxu0 %vm783_vm0, %v1007_v43 }
 0x1ba   : > { %3840 = vmatprep.mubr.msk.bf16.mxu0 %vm4385_vm1, %v5900_v7 }
 0x27c   : > { %v887_v46 = vpop.f32.mrb[0].mxu0  ;;  %v982_v47 = vpop.f32.mrb[0].mxu1 }
 0x27d   : > { %v4900_v48 = vmul.f32 %v3676_v44, %v887_v46  ;;  %v996_v49 = vmul.f32 %v3683_v45, %v982_v47  ;;  %v3782_v50 = vpop.f32.mrb[1].mxu0  ;;  %v3794_v51 = vpop.f32.mrb[1].mxu1 }
 0x27e   : > { %v890_v52 = vpop.f32.mrb[2].mxu0  ;;  %v985_v53 = vpop.f32.mrb[2].mxu1 }
 0x27f   : > { %1840 = vrot.lane.b32.xlu1 %v996_v49, %s4386_s11  ;;  %v3795_v54 = vpop.f32.mrb[3].mxu1  ;;  %v3783_v55 = vpop.f32.mrb[3].mxu0  ;;  %1299 = vrot.lane.b32.xlu0 %v4900_v48, %s4386_s11  ;;  %v4907_v56 = vmul.f32 %v3683_v45, %v985_v53  ;;  %v4913_v58 = vmul.f32 %v3676_v44, %v890_v52  ;;  %v1853_v9 = vrot.slane %v996_v49, %v4924_v5 }
 0x280   : > { %v1846_v19 = vcombine.high %v996_v49, %v5900_v7 }
 0x281   : > { %v1919_v33 = vrot.slane %v4907_v56, %v4924_v5 }
 0x282   : > { %v1860_v23 = vrot.slane %v1846_v19, %v4924_v5 }
 0x283   : > { %1305 = vrot.lane.b32.xlu1 %v4900_v48, %s4387_s12 }
 0x287   : > { %1311 = vrot.lane.b32.xlu1 %v4900_v48, %s4388_s17 }
 0x28b   : > { %1842 = vrot.lane.b32.xlu1 %v4907_v56, %s4386_s11 }
 0x28c   : > { %v4911_v57 = vpop.f32.mrb[4].mxu0 }
 0x28d   : > { %5988 = vst [vmem:[#allocation29_spill] sm:$0xff] %v4911_v57  ;;  %v3806_v59 = vpop.f32.mrb[5].mxu0 }
 0x28e   : > { %v4915_v60 = vpop.f32.mrb[6].mxu0 }
 0x28f   : > { %5989 = vst [vmem:[#allocation30_spill] sm:$0xff] %v4915_v60  ;;  %v3807_v61 = vpop.f32.mrb[7].mxu0  ;;  %1301 = vrot.lane.b32.xlu1 %v4913_v58, %s4386_s11  ;;  %v5285_v60 = vld [vmem:[#allocation7 + $0x8] sm:$0xff] }
 0x290   : > { %6007 = vst [vmem:[#allocation48_spill] sm:$0xff] %v5285_v60 }
 0x293   : > { %1307 = vrot.lane.b32.xlu1 %v4913_v58, %s4387_s12  ;;  %s6042_s12 = sld [smem:[#allocation67_spill]] }
 0x297   : > { %1313 = vrot.lane.b32.xlu1 %v4913_v58, %s4388_s17 }
 0x299   : > { %s777_s17 = scalar_lea.vmem %s6042_s12, %s4813_s24  ;;  %s6043_s24 = sld [smem:[#allocation68_spill]] }
 0x29a   : > { %s4397_s12 = smov [#allocation12]  }
 0x2f1   : > { %v1841_v8 = vpop.permute.xlu1 %1840  ;;  %v1300_v34 = vpop.permute.xlu0 %1299 }
 0x2f2   : > { %v1868_v10 = vrot.slane %v1841_v8, %v4924_v5  ;;  %v1861_v16 = vcombine.high %v1841_v8, %v5900_v7 }
 0x2f4   : > { %v1876_v12 = vcombine.low %v1853_v9, %v1868_v10  ;;  %v1877_v13 = vcombine.high %v1853_v9, %v1868_v10  ;;  %v1875_v21 = vrot.slane %v1861_v16, %v4924_v5  ;;  %v1912_v10 = vcombine.high %v4907_v56, %v5900_v7 }
 0x2f5   : > { %v1306_v14 = vpop.permute.xlu1 %1305 }
 0x2f6   : > { %v4932_v15 = vrot.slane %v1876_v12, %v4929_v11  ;;  %v4942_v18 = vrot.slane %v1877_v13, %v4929_v11  ;;  %v1892_v25 = vcombine.low %v1860_v23, %v1875_v21  ;;  %v1893_v29 = vcombine.high %v1860_v23, %v1875_v21 }
 0x2f7   : > { %v1317_v39 = vcombine.low %v4900_v48, %v1306_v14  ;;  %v1318_v50 = vcombine.high %v4900_v48, %v1306_v14  ;;  %v1926_v16 = vrot.slane %v1912_v10, %v4924_v5 }
 0x2f8   : > { %2074 = vrot.lane.b32.xlu1 %v4932_v15, %s4391_s27  ;;  %v4939_v17 = vcombine.high %v4932_v15, %v5900_v7  ;;  %v4952_v22 = vcombine.high %v4942_v18, %v5900_v7  ;;  %v1978_v24 = vsub.f32 0.0, %v4932_v15  ;;  %v1980_v28 = vsub.f32 0.0, %v4942_v18 }
 0x2f9   : > { %v1312_v20 = vpop.permute.xlu1 %1311  ;;  %v4966_v32 = vrot.slane %v1892_v25, %v4929_v11  ;;  %v4978_v38 = vrot.slane %v1893_v29, %v4929_v11  ;;  %v1325_v44 = vrot.slane %v1317_v39, %v4924_v5  ;;  %v1332_v55 = vrot.slane %v1318_v50, %v4924_v5 }
 0x2fa   : > { %2076 = vrot.lane.b32.xlu0 %v4939_v17, %s4391_s27  ;;  %v1979_v26 = vsub.f32 0.0, %v4939_v17  ;;  %v1981_v31 = vsub.f32 0.0, %v4952_v22  ;;  %v1333_v35 = vcombine.low %v1300_v34, %v1312_v20  ;;  %v1334_v45 = vcombine.high %v1300_v34, %v1312_v20 }
 0x2fb   : > { %v4975_v37 = vcombine.high %v4966_v32, %v5900_v7  ;;  %v4991_v43 = vcombine.high %v4978_v38, %v5900_v7  ;;  %v1982_v6 = vsub.f32 0.0, %v4966_v32  ;;  %v1984_v12 = vsub.f32 0.0, %v4978_v38 }
 0x2fc   : > { %2078 = vrot.lane.b32.xlu1 %v4942_v18, %s4391_s27  ;;  %v1341_v40 = vrot.slane %v1333_v35, %v4924_v5  ;;  %v1348_v51 = vrot.slane %v1334_v45, %v4924_v5 }
 0x2fd   : > { %v1843_v27 = vpop.permute.xlu1 %1842  ;;  %v1983_v9 = vsub.f32 0.0, %v4975_v37  ;;  %v1985_v14 = vsub.f32 0.0, %v4991_v43 }
 0x2fe   : > { %2080 = vrot.lane.b32.xlu0 %v4952_v22, %s4391_s27  ;;  %v1934_v30 = vrot.slane %v1843_v27, %v4924_v5  ;;  %v1349_v46 = vcombine.low %v1325_v44, %v1341_v40  ;;  %v1350_v52 = vcombine.high %v1325_v44, %v1341_v40  ;;  %v1365_v48 = vcombine.low %v1332_v55, %v1348_v51 }
 0x2ff   : > { %v1366_v62 = vcombine.high %v1332_v55, %v1348_v51  ;;  %v1927_v8 = vcombine.high %v1843_v27, %v5900_v7 }
 0x300   : > { %2010 = vrot.lane.b32.xlu1 %v1978_v24, %s4392_s30  ;;  %v1942_v36 = vcombine.low %v1919_v33, %v1934_v30  ;;  %v1943_v41 = vcombine.high %v1919_v33, %v1934_v30  ;;  %v5016_v54 = vrot.slane %v1349_v46, %v4929_v11  ;;  %v5028_v61 = vrot.slane %v1350_v52, %v4929_v11 }
 0x301   : > { %v5039_v0 = vrot.slane %v1365_v48, %v4929_v11  ;;  %v5050_v3 = vrot.slane %v1366_v62, %v4929_v11  ;;  %v1941_v13 = vrot.slane %v1927_v8, %v4924_v5  ;;  %v1302_v21 = vpop.permute.xlu1 %1301 }
 0x302   : > { %2012 = vrot.lane.b32.xlu0 %v1979_v26, %s4392_s30  ;;  %v4985_v42 = vrot.slane %v1942_v36, %v4929_v11  ;;  %v4997_v47 = vrot.slane %v1943_v41, %v4929_v11  ;;  %v5025_v59 = vcombine.high %v5016_v54, %v5900_v7  ;;  %v5036_v63 = vcombine.high %v5028_v61, %v5900_v7 }
 0x303   : > { %v5047_v2 = vcombine.high %v5039_v0, %v5900_v7  ;;  %5992 = vst [vmem:[#allocation33_spill] sm:$0xff] %v5050_v3  ;;  %v5058_v4 = vcombine.high %v5050_v3, %v5900_v7  ;;  %v1958_v20 = vcombine.low %v1926_v16, %v1941_v13  ;;  %v1959_v24 = vcombine.high %v1926_v16, %v1941_v13 }
 0x304   : > { %2014 = vrot.lane.b32.xlu1 %v1980_v28, %s4392_s30  ;;  %v5003_v49 = vcombine.high %v4985_v42, %v5900_v7  ;;  %v5013_v53 = vcombine.high %v4997_v47, %v5900_v7  ;;  %v1986_v19 = vsub.f32 0.0, %v4985_v42  ;;  %v1988_v23 = vsub.f32 0.0, %v4997_v47 }
 0x305   : > { %5991 = vst [vmem:[#allocation32_spill] sm:$0xff] %v5047_v2  ;;  %5993 = vst [vmem:[#allocation34_spill] sm:$0xff] %v5058_v4  ;;  %v5083_v26 = vrot.slane %v1958_v20, %v4929_v11  ;;  %v1308_v27 = vpop.permute.xlu1 %1307  ;;  %v5093_v29 = vrot.slane %v1959_v24, %v4929_v11  ;;  %v1453_v33 = vsub.f32 0.0, %v5016_v54  ;;  %v1454_v35 = vsub.f32 0.0, %v5025_v59 }
 0x306   : > { %2016 = vrot.lane.b32.xlu0 %v1981_v31, %s4392_s30  ;;  %v1987_v56 = vsub.f32 0.0, %v5003_v49  ;;  %v1989_v25 = vsub.f32 0.0, %v5013_v53  ;;  %v1385_v36 = vcombine.low %v4913_v58, %v1308_v27  ;;  %v1455_v39 = vsub.f32 0.0, %v5028_v61 }
 0x307   : > { %5994 = vst [vmem:[#allocation35_spill] sm:$0xff] %v5083_v26  ;;  %v5090_v28 = vcombine.high %v5083_v26, %v5900_v7  ;;  %5996 = vst [vmem:[#allocation37_spill] sm:$0xff] %v5093_v29  ;;  %v5101_v30 = vcombine.high %v5093_v29, %v5900_v7  ;;  %v1456_v41 = vsub.f32 0.0, %v5036_v63  ;;  %v1457_v45 = vsub.f32 0.0, %v5039_v0 }
 0x308   : > { %2082 = vrot.lane.b32.xlu1 %v4966_v32, %s4391_s27  ;;  %v1393_v44 = vrot.slane %v1385_v36, %v4924_v5  ;;  %v1458_v51 = vsub.f32 0.0, %v5047_v2  ;;  %v1386_v52 = vcombine.high %v4913_v58, %v1308_v27  ;;  %v1459_v55 = vsub.f32 0.0, %v5050_v3 }
 0x309   : > { %5995 = vst [vmem:[#allocation36_spill] sm:$0xff] %v5090_v28  ;;  %5997 = vst [vmem:[#allocation38_spill] sm:$0xff] %v5101_v30  ;;  %v1314_v31 = vpop.permute.xlu1 %1313  ;;  %v1992_v24 = vsub.f32 0.0, %v5093_v29 }
 0x30a   : > { %2084 = vrot.lane.b32.xlu0 %v4975_v37, %s4391_s27  ;;  %v1401_v34 = vcombine.low %v1302_v21, %v1314_v31  ;;  %v1402_v46 = vcombine.high %v1302_v21, %v1314_v31  ;;  %v1991_v21 = vsub.f32 0.0, %v5090_v28 }
 0x30c   : > { %2086 = vrot.lane.b32.xlu1 %v4978_v38, %s4391_s27  ;;  %v1409_v40 = vrot.slane %v1401_v34, %v4924_v5  ;;  %v1416_v48 = vrot.slane %v1402_v46, %v4924_v5  ;;  %v5174_v34 = vld [vmem:[#allocation8] sm:$0xff] }
 0x30e   : > { %2088 = vrot.lane.b32.xlu0 %v4991_v43, %s4391_s27  ;;  %v1417_v50 = vcombine.low %v1393_v44, %v1409_v40  ;;  %v1418_v62 = vcombine.high %v1393_v44, %v1409_v40 }
 0x310   : > { %2090 = vrot.lane.b32.xlu1 %v4985_v42, %s4391_s27  ;;  %v5126_v8 = vrot.slane %v1417_v50, %v4929_v11 }
 0x312   : > { %2092 = vrot.lane.b32.xlu0 %v5003_v49, %s4391_s27  ;;  %5998 = vst [vmem:[#allocation39_spill] sm:$0xff] %v5126_v8  ;;  %v5134_v58 = vcombine.high %v5126_v8, %v5900_v7  ;;  %v1461_v31 = vsub.f32 0.0, %v5126_v8 }
 0x314   : > { %2094 = vrot.lane.b32.xlu1 %v4997_v47, %s4391_s27  ;;  %5999 = vst [vmem:[#allocation40_spill] sm:$0xff] %v5134_v58  ;;  %v1462_v36 = vsub.f32 0.0, %v5134_v58 }
 0x316   : > { %2096 = vrot.lane.b32.xlu0 %v5013_v53, %s4391_s27 }
 0x318   : > { %1549 = vrot.lane.b32.xlu1 %v5016_v54, %s4391_s27 }
 0x31a   : > { %1551 = vrot.lane.b32.xlu0 %v5025_v59, %s4391_s27 }
 0x31c   : > { %1553 = vrot.lane.b32.xlu1 %v5028_v61, %s4391_s27 }
 0x31e   : > { %1555 = vrot.lane.b32.xlu0 %v5036_v63, %s4391_s27 }
 0x320   : > { %1557 = vrot.lane.b32.xlu1 %v5039_v0, %s4391_s27 }
 0x322   : > { %1559 = vrot.lane.b32.xlu0 %v5047_v2, %s4391_s27 }
 0x324   : > { %1561 = vrot.lane.b32.xlu1 %v5050_v3, %s4391_s27 }
 0x326   : > { %1563 = vrot.lane.b32.xlu0 %v5058_v4, %s4391_s27 }
 0x328   : > { %2018 = vrot.lane.b32.xlu1 %v1982_v6, %s4392_s30  ;;  %v1460_v6 = vsub.f32 0.0, %v5058_v4 }
 0x32a   : > { %2020 = vrot.lane.b32.xlu0 %v1983_v9, %s4392_s30  ;;  %v1400_v9 = vrot.slane %v1386_v52, %v4924_v5 }
 0x32c   : > { %2022 = vrot.lane.b32.xlu1 %v1984_v12, %s4392_s30  ;;  %v1433_v10 = vcombine.low %v1400_v9, %v1416_v48  ;;  %v5137_v12 = vrot.slane %v1418_v62, %v4929_v11 }
 0x32e   : > { %2024 = vrot.lane.b32.xlu0 %v1985_v14, %s4392_s30  ;;  %6000 = vst [vmem:[#allocation41_spill] sm:$0xff] %v5137_v12  ;;  %v5145_v13 = vcombine.high %v5137_v12, %v5900_v7  ;;  %v5148_v14 = vrot.slane %v1433_v10, %v4929_v11  ;;  %v1463_v40 = vsub.f32 0.0, %v5137_v12 }
 0x330   : > { %2026 = vrot.lane.b32.xlu1 %v1986_v19, %s4392_s30  ;;  %6001 = vst [vmem:[#allocation42_spill] sm:$0xff] %v5145_v13  ;;  %6002 = vst [vmem:[#allocation43_spill] sm:$0xff] %v5148_v14  ;;  %v5156_v16 = vcombine.high %v5148_v14, %v5900_v7  ;;  %v4393_v19 = vmov 1966171168  }
 0x331   : > { %v1099_v20 = vunpack.c.l.s4 %v4393_v19 }
 0x332   : > { %2028 = vrot.lane.b32.xlu0 %v1987_v56, %s4392_s30  ;;  %6003 = vst [vmem:[#allocation44_spill] sm:$0xff] %v5156_v16  ;;  %v1990_v56 = vsub.f32 0.0, %v5083_v26 }
 0x334   : > { %2030 = vrot.lane.b32.xlu1 %v1988_v23, %s4392_s30  ;;  %v1100_v23 = vunpack.c.0.s8 %v1099_v20 }
 0x336   : > { %2032 = vrot.lane.b32.xlu0 %v1989_v25, %s4392_s30  ;;  %v1993_v25 = vsub.f32 0.0, %v5101_v30  ;;  %v5168_v27 = vsub.s32 %v1100_v23, %v4921_v1 }
 0x338   : > { %2098 = vrot.lane.b32.xlu1 %v5083_v26, %s4391_s27  ;;  %6004 = vst [vmem:[#allocation45_spill] sm:$0xff] %v5168_v27 }
 0x33a   : > { %2100 = vrot.lane.b32.xlu0 %v5090_v28, %s4391_s27 }
 0x33c   : > { %2102 = vrot.lane.b32.xlu1 %v5093_v29, %s4391_s27 }
 0x33e   : > { %2104 = vrot.lane.b32.xlu0 %v5101_v30, %s4391_s27 }
 0x340   : > { %1485 = vrot.lane.b32.xlu1 %v1453_v33, %s4392_s30  ;;  %v5172_v33 = vld [vmem:[#allocation7] sm:$0xff] }
 0x342   : > { %1487 = vrot.lane.b32.xlu0 %v1454_v35, %s4392_s30  ;;  %v1434_v35 = vcombine.high %v1400_v9, %v1416_v48  ;;  %v5193_v48 = vsub.s32 0, %v4921_v1 }
 0x344   : > { %1489 = vrot.lane.b32.xlu1 %v1455_v39, %s4392_s30  ;;  %v1104_v39 = vrot.slane %v5172_v33, %v5168_v27  ;;  %v5185_v44 = vrot.slane %v1434_v35, %v4929_v11 }
 0x346   : > { %1491 = vrot.lane.b32.xlu0 %v1456_v41, %s4392_s30  ;;  %v1206_v41 = vrot.slane %v5174_v34, %v5168_v27  ;;  %6005 = vst [vmem:[#allocation46_spill] sm:$0xff] %v5185_v44  ;;  %v1112_v46 = vcombine.high %v1104_v39, %v1104_v39  ;;  %v5199_v9 = vcombine.high %v5185_v44, %v5900_v7 }
 0x348   : > { %1493 = vrot.lane.b32.xlu1 %v1457_v45, %s4392_s30  ;;  %v1464_v45 = vsub.f32 0.0, %v5145_v13  ;;  %v1214_v52 = vcombine.high %v1206_v41, %v1206_v41  ;;  %6006 = vst [vmem:[#allocation47_spill] sm:$0xff] %v5199_v9  ;;  %v1222_v10 = vrot.slane %v1206_v41, %v5168_v27  ;;  %v1134_v19 = vrot.slane %v1112_v46, %v5168_v27 }
 0x34a   : > { %1495 = vrot.lane.b32.xlu0 %v1458_v51, %s4392_s30  ;;  %v1465_v51 = vsub.f32 0.0, %v5148_v14  ;;  %v1236_v1 = vrot.slane %v1214_v52, %v5168_v27  ;;  %v1244_v35 = vcombine.high %v1222_v10, %v1222_v10 }
 0x34c   : > { %1497 = vrot.lane.b32.xlu1 %v1459_v55, %s4392_s30  ;;  %v1120_v55 = vrot.slane %v1104_v39, %v5168_v27  ;;  %v5219_v41 = vrot.slane %v1236_v1, %v5193_v48 }
 0x34e   : > { %1499 = vrot.lane.b32.xlu0 %v1460_v6, %s4392_s30  ;;  %v1466_v6 = vsub.f32 0.0, %v5156_v16  ;;  %v1142_v23 = vcombine.high %v1120_v55, %v1120_v55 }
 0x350   : > { %1565 = vrot.lane.b32.xlu1 %v5126_v8, %s4391_s27 }
 0x352   : > { %1567 = vrot.lane.b32.xlu0 %v5134_v58, %s4391_s27 }
 0x354   : > { %1569 = vrot.lane.b32.xlu1 %v5137_v12, %s4391_s27 }
 0x356   : > { %1571 = vrot.lane.b32.xlu0 %v5145_v13, %s4391_s27 }
 0x358   : > { %1573 = vrot.lane.b32.xlu1 %v5148_v14, %s4391_s27 }
 0x35a   : > { %1575 = vrot.lane.b32.xlu0 %v5156_v16, %s4391_s27 }
 0x35c   : > { %2034 = vrot.lane.b32.xlu1 %v1990_v56, %s4392_s30  ;;  %v1467_v56 = vsub.f32 0.0, %v5185_v44 }
 0x35e   : > { %2036 = vrot.lane.b32.xlu0 %v1991_v21, %s4392_s30  ;;  %v5207_v21 = vrot.slane %v1120_v55, %v5193_v48 }
 0x360   : > { %2038 = vrot.lane.b32.xlu1 %v1992_v24, %s4392_s30 }
 0x362   : > { %2040 = vrot.lane.b32.xlu0 %v1993_v25, %s4392_s30  ;;  %v1468_v25 = vsub.f32 0.0, %v5199_v9 }
 0x364   : > { %1501 = vrot.lane.b32.xlu1 %v1461_v31, %s4392_s30  ;;  %v5212_v31 = vrot.slane %v1222_v10, %v5193_v48  ;;  %v5231_v10 = vrot.slane %v1244_v35, %v5193_v48 }
 0x366   : > { %1503 = vrot.lane.b32.xlu0 %v1462_v36, %s4392_s30  ;;  %v1144_v36 = vcombine.high %v1134_v19, %v1134_v19 }
 0x368   : > { %1505 = vrot.lane.b32.xlu1 %v1463_v40, %s4392_s30  ;;  %v5216_v40 = vrot.slane %v1134_v19, %v5193_v48 }
 0x36a   : > { %1507 = vrot.lane.b32.xlu0 %v1464_v45, %s4392_s30  ;;  %v2075_v50 = vpop.permute.xlu1 %2074  ;;  %v1246_v45 = vcombine.high %v1236_v1, %v1236_v1 }
 0x36c   : > { %v2077_v62 = vpop.permute.xlu0 %2076  ;;  %1509 = vrot.lane.b32.xlu1 %v1465_v51, %s4392_s30  ;;  %v2138_v51 = vmul.f32 %v4932_v15, %v5207_v21  ;;  %v2139_v15 = vmul.f32 %v4939_v17, %v5216_v40 }
 0x36e   : > { %1511 = vrot.lane.b32.xlu0 %v1466_v6, %s4392_s30  ;;  %v2079_v20 = vpop.permute.xlu1 %2078  ;;  %v5228_v6 = vrot.slane %v1142_v23, %v5193_v48 }
 0x370   : > { %v2081_v24 = vpop.permute.xlu0 %2080  ;;  %1513 = vrot.lane.b32.xlu1 %v1467_v56, %s4392_s30  ;;  %v5235_v56 = vrot.slane %v1144_v36, %v5193_v48  ;;  %v2140_v36 = vmul.f32 %v4942_v18, %v5228_v6 }
 0x372   : > { %1515 = vrot.lane.b32.xlu0 %v1468_v25, %s4392_s30  ;;  %v2011_v39 = vpop.permute.xlu1 %2010  ;;  %v5245_v25 = vrot.slane %v1246_v45, %v5193_v48  ;;  %s4394_s30 = smov 32  }
 0x373   : > { %v2122_v46 = vsel %vm1597_vm2, %v2011_v39, %v2075_v50 }
 0x374   : > { %v2154_v52 = vmul.f32 %v2122_v46, %v5212_v31  ;;  %v2013_v55 = vpop.permute.xlu0 %2012  ;;  %1577 = vrot.lane.b32.xlu1 %v5185_v44, %s4391_s27  ;;  %v5292_v44 = vld [vmem:[#allocation8 + $0x8] sm:$0xff] }
 0x375   : > { %v2123_v19 = vsel %vm1597_vm2, %v2013_v55, %v2077_v62  ;;  %6008 = vst [vmem:[#allocation49_spill] sm:$0xff] %v5292_v44  ;;  %v1255_v8 = vrot.slane %v5292_v44, %v5168_v27 }
 0x376   : > { %v5237_v50 = vadd.f32 %v2154_v52, %v2138_v51  ;;  %v2155_v1 = vmul.f32 %v2123_v19, %v5219_v41  ;;  %1579 = vrot.lane.b32.xlu0 %v5199_v9, %s4391_s27  ;;  %v2015_v23 = vpop.permute.xlu1 %2014  ;;  %v2141_v52 = vmul.f32 %v4952_v22, %v5235_v56  ;;  %v1097_v22 = vcombine.high %v5172_v33, %v5172_v33 }
 0x377   : > { %v2124_v35 = vsel %vm1597_vm2, %v2015_v23, %v2079_v20  ;;  %v1271_v44 = vrot.slane %v1255_v8, %v5168_v27 }
 0x378   : > { %v5248_v62 = vadd.f32 %v2155_v1, %v2139_v15  ;;  %v2156_v39 = vmul.f32 %v2124_v35, %v5231_v10  ;;  %v2017_v46 = vpop.permute.xlu0 %2016 }
 0x379   : > { %v2125_v17 = vsel %vm1597_vm2, %v2017_v46, %v2081_v24 }
 0x37a   : > { %v5254_v51 = vadd.f32 %v2156_v39, %v2140_v36  ;;  %v2157_v45 = vmul.f32 %v2125_v17, %v5245_v25  ;;  %v2083_v55 = vpop.permute.xlu1 %2082  ;;  %v1199_v39 = vcombine.high %v5174_v34, %v5174_v34  ;;  %v1111_v17 = vrot.slane %v1097_v22, %v5168_v27 }
 0x37b   : > { %v1153_v34 = vrot.slane %v5285_v60, %v5168_v27 }
 0x37c   : > { %v5259_v19 = vadd.f32 %v2157_v45, %v2141_v52  ;;  %v2085_v20 = vpop.permute.xlu0 %2084  ;;  %v1213_v45 = vrot.slane %v1199_v39, %v5168_v27  ;;  %v1113_v57 = vcombine.high %v1111_v17, %v1111_v17  ;;  %v1127_v13 = vrot.slane %v1111_v17, %v5168_v27 }
 0x37d   : > { %v1161_v17 = vcombine.high %v1153_v34, %v1153_v34 }
 0x37e   : > { %v2087_v15 = vpop.permute.xlu1 %2086  ;;  %v1215_v33 = vcombine.high %v1213_v45, %v1213_v45  ;;  %v1229_v12 = vrot.slane %v1213_v45, %v5168_v27  ;;  %v1141_v39 = vrot.slane %v1113_v57, %v5168_v27  ;;  %v1143_v14 = vcombine.high %v1127_v13, %v1127_v13 }
 0x37f   : > { %v5306_v30 = vrot.slane %v1127_v13, %v5193_v48 }
 0x380   : > { %v5261_v1 = vpop.permute.xlu0 %2088  ;;  %v1243_v16 = vrot.slane %v1215_v33, %v5168_v27  ;;  %v5309_v29 = vrot.slane %v1229_v12, %v5193_v48  ;;  %v1245_v45 = vcombine.high %v1229_v12, %v1229_v12  ;;  %v1145_v28 = vcombine.high %v1141_v39, %v1141_v39 }
 0x381   : > { %v5312_v57 = vrot.slane %v1141_v39, %v5193_v48  ;;  %v1169_v33 = vrot.slane %v1153_v34, %v5168_v27  ;;  %v5320_v13 = vrot.slane %v1143_v14, %v5193_v48  ;;  %v1183_v12 = vrot.slane %v1161_v17, %v5168_v27 }
 0x382   : > { %v5263_v18 = vpop.permute.xlu1 %2090  ;;  %v5316_v4 = vrot.slane %v1243_v16, %v5193_v48  ;;  %v1247_v3 = vcombine.high %v1243_v16, %v1243_v16  ;;  %v2142_v39 = vmul.f32 %v4966_v32, %v5306_v30  ;;  %v5328_v60 = vrot.slane %v1245_v45, %v5193_v48 }
 0x383   : > { %v5331_v16 = vrot.slane %v1145_v28, %v5193_v48  ;;  %v2144_v28 = vmul.f32 %v4978_v38, %v5320_v13  ;;  %v5357_v38 = vrot.slane %v1183_v12, %v5193_v48 }
 0x384   : > { %v5265_v23 = vpop.permute.xlu0 %2092  ;;  %6012 = vst [vmem:[#allocation53_spill] sm:$0xff] %v5316_v4 }
 0x386   : > { %v5267_v35 = vpop.permute.xlu1 %2094 }
 0x388   : > { %v5269_v24 = vpop.permute.xlu0 %2096 }
 0x38a   : > { %v5273_v36 = vpop.permute.xlu1 %1549 }
 0x38c   : > { %v5277_v46 = vpop.permute.xlu0 %1551 }
 0x38e   : > { %v5280_v52 = vpop.permute.xlu1 %1553 }
 0x390   : > { %v5283_v7 = vpop.permute.xlu0 %1555 }
 0x392   : > { %v5287_v9 = vpop.permute.xlu1 %1557 }
 0x394   : > { %v5294_v22 = vpop.permute.xlu0 %1559 }
 0x395   : > { %6009 = vst [vmem:[#allocation50_spill] sm:$0xff] %v5294_v22  ;;  %v5341_v22 = vrot.slane %v1247_v3, %v5193_v48  ;;  %v2145_v3 = vmul.f32 %v4991_v43, %v5331_v16 }
 0x396   : > { %v5298_v58 = vpop.permute.xlu1 %1561 }
 0x397   : > { %6010 = vst [vmem:[#allocation51_spill] sm:$0xff] %v5298_v58  ;;  %v1263_v58 = vcombine.high %v1255_v8, %v1255_v8  ;;  %v5337_v8 = vrot.slane %v1169_v33, %v5193_v48 }
 0x398   : > { %v5303_v11 = vpop.permute.xlu0 %1563 }
 0x399   : > { %6011 = vst [vmem:[#allocation52_spill] sm:$0xff] %v5303_v11  ;;  %v1285_v45 = vrot.slane %v1263_v58, %v5168_v27 }
 0x39a   : > { %v2019_v26 = vpop.permute.xlu1 %2018 }
 0x39b   : > { %v2126_v11 = vsel %vm1597_vm2, %v2019_v26, %v2083_v55  ;;  %v2143_v26 = vmul.f32 %v4975_v37, %v5312_v57  ;;  %v1191_v55 = vcombine.high %v1169_v33, %v1169_v33 }
 0x39c   : > { %v2158_v34 = vmul.f32 %v2126_v11, %v5309_v29  ;;  %v2021_v2 = vpop.permute.xlu0 %2020 }
 0x39d   : > { %v2127_v14 = vsel %vm1597_vm2, %v2021_v2, %v2085_v20  ;;  %v5348_v2 = vrot.slane %v1271_v44, %v5193_v48  ;;  %v1193_v20 = vcombine.high %v1183_v12, %v1183_v12 }
 0x39e   : > { %v2174_v17 = vadd.f32 %v2158_v34, %v2142_v39  ;;  %v2159_v32 = vmul.f32 %v2127_v14, %v5316_v4  ;;  %v2023_v11 = vpop.permute.xlu1 %2022  ;;  %v1293_v4 = vcombine.high %v1271_v44, %v1271_v44  ;;  %v2146_v44 = vmul.f32 %v4985_v42, %v5337_v8 }
 0x39f   : > { %v2128_v37 = vsel %vm1597_vm2, %v2023_v11, %v2087_v15  ;;  %v1295_v15 = vcombine.high %v1285_v45, %v1285_v45  ;;  %v5372_v12 = vrot.slane %v1193_v20, %v5193_v48 }
 0x3a0   : > { %v3699_v33 = vpack.c.bf16 %v2174_v17, %v5237_v50  ;;  %v2175_v39 = vadd.f32 %v2159_v32, %v2143_v26  ;;  %v2160_v34 = vmul.f32 %v2128_v37, %v5328_v60  ;;  %v2025_v14 = vpop.permute.xlu0 %2024  ;;  %v5362_v17 = vrot.slane %v1285_v45, %v5193_v48 }
 0x3a1   : > { %v2129_v58 = vsel %vm1597_vm2, %v2025_v14, %v5261_v1  ;;  %v5369_v1 = vrot.slane %v1191_v55, %v5193_v48  ;;  %v5377_v45 = vrot.slane %v1293_v4, %v5193_v48  ;;  %v5387_v20 = vrot.slane %v1295_v15, %v5193_v48 }
 0x3a2   : > { %v3703_v11 = vpack.c.bf16 %v2175_v39, %v5248_v62  ;;  %v2176_v27 = vadd.f32 %v2160_v34, %v2144_v28  ;;  %v2161_v50 = vmul.f32 %v2129_v58, %v5341_v22  ;;  %v2027_v26 = vpop.permute.xlu1 %2026  ;;  %v5380_v42 = vrot.slane %v3699_v33, %v4924_v5 }
 0x3a3   : > { %v2130_v43 = vsel %vm1597_vm2, %v2027_v26, %v5263_v18  ;;  %v2147_v18 = vmul.f32 %v5003_v49, %v5357_v38  ;;  %v2148_v49 = vmul.f32 %v4997_v47, %v5369_v1 }
 0x3a4   : > { %v3700_v62 = vpack.c.bf16 %v2176_v27, %v5254_v51  ;;  %v2177_v32 = vadd.f32 %v2161_v50, %v2145_v3  ;;  %v2162_v28 = vmul.f32 %v2130_v43, %v5348_v2  ;;  %v2029_v37 = vpop.permute.xlu0 %2028  ;;  %v5397_v34 = vrot.slane %v3703_v11, %v4924_v5 }
 0x3a5   : > { %v2131_v55 = vsel %vm1597_vm2, %v2029_v37, %v5265_v23 }
 0x3a6   : > { %v5390_v27 = vrot.slane %v3700_v62, %v4924_v5  ;;  %v3704_v51 = vpack.c.bf16 %v2177_v32, %v5259_v19  ;;  %v5393_v39 = vadd.f32 %v2162_v28, %v2146_v44  ;;  %v2163_v4 = vmul.f32 %v2131_v55, %v5362_v17  ;;  %v2031_v33 = vpop.permute.xlu1 %2030 }
 0x3a7   : > { %v2132_v23 = vsel %vm1597_vm2, %v2031_v33, %v5267_v35  ;;  %v2149_v35 = vmul.f32 %v5013_v53, %v5372_v12  ;;  %v1695_v33 = vmul.f32 %v5216_v40, %v5025_v59  ;;  %v1697_v59 = vmul.f32 %v5235_v56, %v5036_v63  ;;  %v6015_v56 = vld [vmem:[#allocation32_spill] sm:$0xff] }
 0x3a8   : > { %v2502_v14 = vcombine.low %v5380_v42, %v5390_v27  ;;  %v5406_v3 = vrot.slane %v3704_v51, %v4924_v5  ;;  %v5408_v19 = vadd.f32 %v2163_v4, %v2147_v18  ;;  %v2164_v58 = vmul.f32 %v2132_v23, %v5377_v45  ;;  %v2033_v15 = vpop.permute.xlu0 %2032 }
 0x3a9   : > { %v2133_v11 = vsel %vm1597_vm2, %v2033_v15, %v5269_v24  ;;  %v1694_v18 = vmul.f32 %v5207_v21, %v5016_v54  ;;  %v1696_v54 = vmul.f32 %v5228_v6, %v5028_v61  ;;  %v1698_v61 = vmul.f32 %v5306_v30, %v5039_v0  ;;  %v6018_v0 = vld [vmem:[#allocation51_spill] sm:$0xff] }
 0x3aa   : > { %v2551_v47 = vcombine.low %v5397_v34, %v5406_v3  ;;  %v5415_v50 = vadd.f32 %v2164_v58, %v2148_v49  ;;  %v2165_v26 = vmul.f32 %v2133_v11, %v5387_v20  ;;  %v5420_v44 = vpop.permute.xlu1 %2098 }
 0x3ac   : > { %v5422_v43 = vadd.f32 %v2165_v26, %v2149_v35  ;;  %v5424_v62 = vpop.permute.xlu0 %2100  ;;  %v6013_v35 = vld [vmem:[#allocation50_spill] sm:$0xff]  ;;  %v6014_v26 = vld [vmem:[#allocation48_spill] sm:$0xff] }
 0x3ae   : > { %v5426_v32 = vpop.permute.xlu1 %2102 }
 0x3b0   : > { %v5428_v28 = vpop.permute.xlu0 %2104 }
 0x3b2   : > { %v1486_v24 = vpop.permute.xlu1 %1485 }
 0x3b3   : > { %v1598_v37 = vsel %vm1597_vm2, %v1486_v24, %v5273_v36  ;;  %v1146_v24 = vcombine.high %v6014_v26, %v6014_v26 }
 0x3b4   : > { %v1790_v53 = vmul.f32 %v5212_v31, %v1598_v37  ;;  %v1488_v55 = vpop.permute.xlu0 %1487  ;;  %v6016_v37 = vld [vmem:[#allocation53_spill] sm:$0xff] }
 0x3b5   : > { %v1599_v51 = vsel %vm1597_vm2, %v1488_v55, %v5277_v46 }
 0x3b6   : > { %v1806_v4 = vadd.f32 %v1790_v53, %v1694_v18  ;;  %v1791_v49 = vmul.f32 %v5219_v41, %v1599_v51  ;;  %v1490_v23 = vpop.permute.xlu1 %1489  ;;  %v6017_v53 = vld [vmem:[#allocation49_spill] sm:$0xff] }
 0x3b7   : > { %v1600_v58 = vsel %vm1597_vm2, %v1490_v23, %v5280_v52  ;;  %v1248_v55 = vcombine.high %v6017_v53, %v6017_v53 }
 0x3b8   : > { %v1807_v36 = vadd.f32 %v1791_v49, %v1695_v33  ;;  %v1792_v21 = vmul.f32 %v5231_v10, %v1600_v58  ;;  %v1492_v31 = vpop.permute.xlu0 %1491  ;;  %v6019_v33 = vld [vmem:[#allocation33_spill] sm:$0xff] }
 0x3b9   : > { %v1601_v46 = vsel %vm1597_vm2, %v1492_v31, %v5283_v7  ;;  %v1700_v49 = vmul.f32 %v5320_v13, %v6019_v33 }
 0x3ba   : > { %v1808_v15 = vadd.f32 %v1792_v21, %v1696_v54  ;;  %v1793_v40 = vmul.f32 %v5245_v25, %v1601_v46  ;;  %v1494_v41 = vpop.permute.xlu1 %1493  ;;  %v1699_v25 = vmul.f32 %v5312_v57, %v6015_v56  ;;  %v6020_v54 = vld [vmem:[#allocation34_spill] sm:$0xff]  ;;  %v6021_v21 = vld [vmem:[#allocation52_spill] sm:$0xff]  ;;  %v6022_v46 = vld [vmem:[#allocation45_spill] sm:$0xff] }
 0x3bb   : > { %v1602_v52 = vsel %vm1597_vm2, %v1494_v41, %v5287_v9  ;;  %v1701_v57 = vmul.f32 %v5331_v16, %v6020_v54 }
 0x3bc   : > { %v1809_v11 = vadd.f32 %v1793_v40, %v1697_v59  ;;  %v1794_v6 = vmul.f32 %v5309_v29, %v1602_v52  ;;  %v1496_v10 = vpop.permute.xlu0 %1495  ;;  %v1160_v59 = vrot.slane %v1146_v24, %v6022_v46 }
 0x3bd   : > { %v1603_v7 = vsel %vm1597_vm2, %v1496_v10, %v6013_v35 }
 0x3be   : > { %v1810_v63 = vadd.f32 %v1794_v6, %v1698_v61  ;;  %v1795_v18 = vmul.f32 %v6016_v37, %v1603_v7  ;;  %v1498_v9 = vpop.permute.xlu1 %1497  ;;  %v1262_v61 = vrot.slane %v1248_v55, %v6022_v46  ;;  %v1162_v10 = vcombine.high %v1160_v59, %v1160_v59 }
 0x3bf   : > { %v1604_v29 = vsel %vm1597_vm2, %v1498_v9, %v6018_v0 }
 0x3c0   : > { %v3691_v30 = vpack.c.bf16 %v1810_v63, %v1806_v4  ;;  %v1811_v51 = vadd.f32 %v1795_v18, %v1699_v25  ;;  %v1796_v23 = vmul.f32 %v5328_v60, %v1604_v29  ;;  %v1500_v58 = vpop.permute.xlu0 %1499  ;;  %v1264_v26 = vcombine.high %v1262_v61, %v1262_v61 }
 0x3c1   : > { %v1605_v31 = vsel %vm1597_vm2, %v1500_v58, %v6021_v21  ;;  %v1278_v25 = vrot.slane %v1262_v61, %v6022_v46 }
 0x3c2   : > { %v3695_v40 = vpack.c.bf16 %v1811_v51, %v1807_v36  ;;  %v1812_v41 = vadd.f32 %v1796_v23, %v1700_v49  ;;  %v1797_v52 = vmul.f32 %v5341_v22, %v1605_v31  ;;  %v5475_v4 = vpop.permute.xlu1 %1565  ;;  %v5481_v16 = vrot.slane %v3691_v30, %v4924_v5 }
 0x3c3   : > { %v1176_v22 = vrot.slane %v1160_v59, %v6022_v46  ;;  %v1292_v9 = vrot.slane %v1264_v26, %v6022_v46  ;;  %v1761_v0 = vrot.slane %v1278_v25, %v5193_v48  ;;  %v1294_v30 = vcombine.high %v1278_v25, %v1278_v25 }
 0x3c4   : > { %v3692_v13 = vpack.c.bf16 %v1812_v41, %v1808_v15  ;;  %v1813_v6 = vadd.f32 %v1797_v52, %v1701_v57  ;;  %v5478_v60 = vpop.permute.xlu0 %1567  ;;  %v5490_v24 = vrot.slane %v3695_v40, %v4924_v5  ;;  %v6023_v57 = vld [vmem:[#allocation35_spill] sm:$0xff] }
 0x3c5   : > { %v5505_v55 = vrot.slane %v1176_v22, %v5193_v48  ;;  %v1192_v29 = vcombine.high %v1176_v22, %v1176_v22  ;;  %v1765_v23 = vrot.slane %v1292_v9, %v5193_v48  ;;  %v1296_v58 = vcombine.high %v1292_v9, %v1292_v9 }
 0x3c6   : > { %v5484_v35 = vrot.slane %v3692_v13, %v4924_v5  ;;  %v3696_v7 = vpack.c.bf16 %v1813_v6, %v1809_v11  ;;  %v5486_v36 = vpop.permute.xlu1 %1569  ;;  %v1190_v11 = vrot.slane %v1162_v10, %v6022_v46  ;;  %v5520_v40 = vrot.slane %v1294_v30, %v5193_v48 }
 0x3c7   : > { %v2150_v21 = vmul.f32 %v6023_v57, %v5505_v55  ;;  %v5517_v59 = vrot.slane %v1192_v29, %v5193_v48 }
 0x3c8   : > { %v2390_v15 = vcombine.low %v5481_v16, %v5484_v35  ;;  %v5495_v63 = vrot.slane %v3696_v7, %v4924_v5  ;;  %v5497_v56 = vpop.permute.xlu0 %1571  ;;  %v1194_v51 = vcombine.high %v1190_v11, %v1190_v11  ;;  %v5509_v49 = vrot.slane %v1190_v11, %v5193_v48 }
 0x3c9   : > { %v5530_v7 = vrot.slane %v1296_v58, %v5193_v48 }
 0x3ca   : > { %v2440_v37 = vcombine.low %v5490_v24, %v5495_v63  ;;  %v1574_v18 = vpop.permute.xlu1 %1573  ;;  %v5525_v52 = vrot.slane %v1194_v51, %v5193_v48  ;;  %v6026_v48 = vld [vmem:[#allocation38_spill] sm:$0xff] }
 0x3cc   : > { %v1576_v53 = vpop.permute.xlu0 %1575  ;;  %v2153_v58 = vmul.f32 %v6026_v48, %v5525_v52 }
 0x3ce   : > { %v2035_v33 = vpop.permute.xlu1 %2034 }
 0x3cf   : > { %v2134_v54 = vsel %vm1597_vm2, %v2035_v33, %v5420_v44  ;;  %v6024_v44 = vld [vmem:[#allocation36_spill] sm:$0xff] }
 0x3d0   : > { %v2166_v31 = vmul.f32 %v2134_v54, %v1761_v0  ;;  %v2037_v46 = vpop.permute.xlu0 %2036  ;;  %v2151_v13 = vmul.f32 %v6024_v44, %v5509_v49 }
 0x3d1   : > { %v2135_v41 = vsel %vm1597_vm2, %v2037_v46, %v5424_v62  ;;  %v6025_v62 = vld [vmem:[#allocation37_spill] sm:$0xff] }
 0x3d2   : > { %v2182_v61 = vadd.f32 %v2166_v31, %v2150_v21  ;;  %v2167_v6 = vmul.f32 %v2135_v41, %v1765_v23  ;;  %v2039_v10 = vpop.permute.xlu1 %2038  ;;  %v2152_v11 = vmul.f32 %v6025_v62, %v5517_v59 }
 0x3d3   : > { %v2136_v26 = vsel %vm1597_vm2, %v2039_v10, %v5426_v32 }
 0x3d4   : > { %v3701_v22 = vpack.c.bf16 %v2182_v61, %v5393_v39  ;;  %v2183_v25 = vadd.f32 %v2167_v6, %v2151_v13  ;;  %v2168_v9 = vmul.f32 %v2136_v26, %v5520_v40  ;;  %v2041_v29 = vpop.permute.xlu0 %2040  ;;  %v6027_v26 = vld [vmem:[#allocation31_spill] sm:$0xff] }
 0x3d5   : > { %v2137_v30 = vsel %vm1597_vm2, %v2041_v29, %v5428_v28 }
 0x3d6   : > { %v3705_v51 = vpack.c.bf16 %v2183_v25, %v5408_v19  ;;  %v2184_v33 = vadd.f32 %v2168_v9, %v2152_v11  ;;  %v2169_v32 = vmul.f32 %v2137_v30, %v5530_v7  ;;  %v1502_v54 = vpop.permute.xlu1 %1501  ;;  %v2493_v31 = vrot.slane %v3701_v22, %v4924_v5 }
 0x3d7   : > { %v2558_v9 = vrot.slane %v2551_v47, %v6027_v26 }
 0x3d8   : > { %v3702_v39 = vpack.c.bf16 %v2184_v33, %v5415_v50  ;;  %v2185_v57 = vadd.f32 %v2169_v32, %v2153_v58  ;;  %v1504_v21 = vpop.permute.xlu0 %1503  ;;  %v2542_v19 = vrot.slane %v3705_v51, %v4924_v5  ;;  %v2509_v50 = vrot.slane %v2502_v14, %v6027_v26  ;;  %v6028_v33 = vld [vmem:[#allocation43_spill] sm:$0xff] }
 0x3d9   : > { %v1607_v42 = vsel %vm1597_vm2, %v1504_v21, %v5478_v60  ;;  %v1706_v48 = vmul.f32 %v5505_v55, %v6028_v33  ;;  %v6029_v32 = vld [vmem:[#allocation39_spill] sm:$0xff] }
 0x3da   : > { %v2501_v46 = vrot.slane %v3702_v39, %v4924_v5  ;;  %v3706_v41 = vpack.c.bf16 %v2185_v57, %v5422_v43  ;;  %v1506_v28 = vpop.permute.xlu1 %1505  ;;  %v1606_v43 = vsel %vm1597_vm2, %v1502_v54, %v5475_v4  ;;  %v1702_v60 = vmul.f32 %v5337_v8, %v6029_v32  ;;  %v6030_v54 = vld [vmem:[#allocation44_spill] sm:$0xff] }
 0x3db   : > { %v1798_v51 = vmul.f32 %v5348_v2, %v1606_v43  ;;  %v1608_v4 = vsel %vm1597_vm2, %v1506_v28, %v5486_v36  ;;  %v1707_v36 = vmul.f32 %v5509_v49, %v6030_v54 }
 0x3dc   : > { %v2510_v61 = vcombine.low %v2493_v31, %v2501_v46  ;;  %v2550_v44 = vrot.slane %v3706_v41, %v4924_v5  ;;  %v1508_v13 = vpop.permute.xlu0 %1507  ;;  %v1800_v39 = vmul.f32 %v5377_v45, %v1608_v4  ;;  %v6031_v31 = vld [vmem:[#allocation40_spill] sm:$0xff]  ;;  %v6032_v46 = vld [vmem:[#allocation41_spill] sm:$0xff]  ;;  %v6033_v41 = vld [vmem:[#allocation46_spill] sm:$0xff] }
 0x3dd   : > { %v1609_v2 = vsel %vm1597_vm2, %v1508_v13, %v5497_v56  ;;  %v1703_v8 = vmul.f32 %v5357_v38, %v6031_v31  ;;  %v1708_v56 = vmul.f32 %v5517_v59, %v6033_v41  ;;  %v1814_v45 = vadd.f32 %v1798_v51, %v1702_v60  ;;  %v6034_v38 = vld [vmem:[#allocation42_spill] sm:$0xff] }
 0x3de   : > { %v2559_v6 = vcombine.low %v2542_v19, %v2550_v44  ;;  %v1510_v10 = vpop.permute.xlu1 %1509  ;;  %v2517_v22 = vrot.slane %v2510_v61, %v6027_v26  ;;  %v1801_v28 = vmul.f32 %v5387_v20, %v1609_v2  ;;  %v2447_v51 = vrot.slane %v2440_v37, %v6027_v26  ;;  %v2805_v60 = vld [vmem:[#allocation2] sm:$0xff] }
 0x3df   : > { %v1610_v25 = vsel %vm1597_vm2, %v1510_v10, %v1574_v18 }
 0x3e0   : > { %v1512_v62 = vpop.permute.xlu0 %1511  ;;  %v2518_v11 = vcombine.low %v2509_v50, %v2517_v22  ;;  %v2566_v29 = vrot.slane %v2559_v6, %v6027_v26  ;;  %v1802_v27 = vmul.f32 %v1761_v0, %v1610_v25  ;;  %v1799_v0 = vmul.f32 %v5362_v17, %v1607_v42 }
 0x3e1   : > { %v1611_v30 = vsel %vm1597_vm2, %v1512_v62, %v1576_v53  ;;  %v1704_v17 = vmul.f32 %v5369_v1, %v6032_v46  ;;  %v1705_v6 = vmul.f32 %v5372_v12, %v6034_v38  ;;  %v6035_v1 = vld [vmem:[#allocation47_spill] sm:$0xff] }
 0x3e2   : > { %v1514_v14 = vpop.permute.xlu1 %1513  ;;  %v2567_v18 = vcombine.low %v2558_v9, %v2566_v29  ;;  %v1803_v34 = vmul.f32 %v1765_v23, %v1611_v30  ;;  %v2571_v58 = vshrl.u32 %v2518_v11, 16  ;;  %v1818_v55 = vadd.f32 %v1802_v27, %v1706_v48 }
 0x3e3   : > { %v1815_v13 = vadd.f32 %v1799_v0, %v1703_v8  ;;  %v1709_v10 = vmul.f32 %v5525_v52, %v6035_v1  ;;  %v1816_v50 = vadd.f32 %v1800_v39, %v1704_v17  ;;  %v1817_v43 = vadd.f32 %v1801_v28, %v1705_v6 }
 0x3e4   : > { %v1516_v3 = vpop.permute.xlu0 %1515  ;;  %v2570_v47 = vpack.i.b16 %v2567_v18, %v2518_v11  ;;  %v2572_v53 = vshrl.u32 %v2567_v18, 16  ;;  %v1819_v19 = vadd.f32 %v1803_v34, %v1707_v36  ;;  %v3693_v22 = vpack.c.bf16 %v1818_v55, %v1814_v45  ;;  %v2806_v55 = vld [vmem:[#allocation2 + $0x8] sm:$0xff] }
 0x3e6   : > { %3844 = vmatprep.subr.msk.bf16.mxu1 %vm2680_vm3, %v2570_v47  ;;  %v1578_v23 = vpop.permute.xlu1 %1577  ;;  %v2688_v57 = vsel %vm2680_vm3, %v2570_v47, 0  ;;  %v2573_v21 = vpack.i.b16 %v2572_v53, %v2571_v58  ;;  %v3697_v62 = vpack.c.bf16 %v1819_v19, %v1815_v13  ;;  %v2381_v9 = vrot.slane %v3693_v22, %v4924_v5 }
 0x3e7   : > { %v1612_v49 = vsel %vm1597_vm2, %v1514_v14, %v1578_v23  ;;  %3809 = vmatpush3.bf16.xpose.msra.mxu1 %v2688_v57 }
 0x3e8   : > { %v1804_v61 = vmul.f32 %v5520_v40, %v1612_v49  ;;  %v1580_v44 = vpop.permute.xlu0 %1579  ;;  %3845 = vmatprep.subr.msk.bf16.mxu1 %vm2680_vm3, %v2573_v21  ;;  %v2431_v12 = vrot.slane %v3697_v62, %v4924_v5  ;;  %v2746_v24 = vsel %vm2680_vm3, %v2573_v21, 0 }
 0x3e9   : > { %v1613_v59 = vsel %vm1597_vm2, %v1516_v3, %v1580_v44 }
 0x3ea   : > { %v1820_v25 = vadd.f32 %v1804_v61, %v1708_v56  ;;  %v1805_v20 = vmul.f32 %v5530_v7, %v1613_v59  ;;  %v2397_v7 = vrot.slane %v2390_v15, %v6027_v26 }
 0x3ec   : > { %v3694_v40 = vpack.c.bf16 %v1820_v25, %v1816_v50  ;;  %v1821_v11 = vadd.f32 %v1805_v20, %v1709_v10 }
 0x3ee   : > { %v2389_v29 = vrot.slane %v3694_v40, %v4924_v5  ;;  %v3698_v30 = vpack.c.bf16 %v1821_v11, %v1817_v43 }
 0x3f0   : > { %v2398_v42 = vcombine.low %v2381_v9, %v2389_v29  ;;  %v2439_v52 = vrot.slane %v3698_v30, %v4924_v5 }
 0x3f2   : > { %v2448_v27 = vcombine.low %v2431_v12, %v2439_v52  ;;  %v2405_v14 = vrot.slane %v2398_v42, %v6027_v26 }
 0x3f4   : > { %v2406_v18 = vcombine.low %v2397_v7, %v2405_v14  ;;  %v2455_v4 = vrot.slane %v2448_v27, %v6027_v26  ;;  %v2407_v33 = vcombine.high %v2397_v7, %v2405_v14 }
 0x3f6   : > { %v2456_v48 = vcombine.low %v2447_v51, %v2455_v4  ;;  %v2457_v34 = vcombine.high %v2447_v51, %v2455_v4  ;;  %v2461_v3 = vshrl.u32 %v2406_v18, 16  ;;  %v2467_v47 = vshrl.u32 %v2407_v33, 16 }
 0x3f8   : > { %v2460_v58 = vpack.i.b16 %v2456_v48, %v2406_v18  ;;  %v2462_v53 = vshrl.u32 %v2456_v48, 16  ;;  %v2466_v32 = vpack.i.b16 %v2457_v34, %v2407_v33  ;;  %v2468_v16 = vshrl.u32 %v2457_v34, 16 }
 0x3fa   : > { %3810 = vmatprep.mubr.msk.bf16.mxu1 %vm2680_vm3, %v2460_v58  ;;  %v2463_v35 = vpack.i.b16 %v2462_v53, %v2461_v3  ;;  %v2469_v15 = vpack.i.b16 %v2468_v16, %v2467_v47  ;;  %v3690_v47 = vld [vmem:[%s771_s21] ss:$0 sm:$0xff]  ;;  %s3436_s21 = sshll.u32 %s750_s19, 4  ;;  %s5778_s21 = int_to_ptr.vmem [resolvable:$true] %s3436_s21 }
 0x3fb   : > { %v6037_v58 = vld [vmem:[#allocation30_spill] sm:$0xff] }
 0x3fc   : > { %3811 = vmatmul.mubr.msk.bf16.vlgmr.msra.gmra.mrb[4].mxu1 %vm2680_vm3, %v2463_v35  ;;  %v1092_v53 = vmul.f32 %v3690_v47, %v6037_v58 }
 0x3fd   : > { %3815 = vmatpush3.bf16.xpose.msra.mxu1 %v2746_v24  ;;  %3816 = vmatprep.mubr.msk.bf16.mxu1 %vm2680_vm3, %v2466_v32  ;;  %v6038_v32 = vld [vmem:[#allocation29_spill] sm:$0xff] }
 0x3fe   : > { %v1091_v16 = vmul.f32 %v3690_v47, %v6038_v32 }
 0x404   : > { %3817 = vmatmul.mubr.msk.bf16.vlgmr.msra.gmra.mrb[8].mxu1 %vm2680_vm3, %v2469_v15 }
 0x4cf   : > { %v3812_v63 = vpop.f32.mrb[4].mxu1 }
 0x4d0   : > { %v2724_v37 = vpop.f32.mrb[5].mxu1  ;;  %v2799_v54 = vmul.f32 0.25, %v3812_v63 }
 0x4d1   : > { %v2797_v0 = vmul.f32 0.25, %v2724_v37  ;;  %v3813_v2 = vpop.f32.mrb[6].mxu1 }
 0x4d2   : > { %v2800_v36 = vmul.f32 0.25, %v3813_v2  ;;  %v2727_v39 = vpop.f32.mrb[7].mxu1  ;;  %v2809_v46 = vadd.f32 %v2805_v60, %v2799_v54 }
 0x4d3   : > { %v2798_v23 = vmul.f32 0.25, %v2727_v39  ;;  %v2807_v57 = vadd.f32 %v2805_v60, %v2797_v0 }
 0x4d4   : > { %v2810_v21 = vadd.f32 %v2806_v55, %v2800_v36  ;;  %v2821_v61 = vsel %vm2680_vm3, %v2809_v46, -inf }
 0x4d5   : > { %v2815_v31 = vsel %vm2680_vm3, %v2807_v57, -inf  ;;  %v2808_v8 = vadd.f32 %v2806_v55, %v2798_v23 }
 0x4d6   : > { %2816 = vmax.xlane.f32.xlu1 %v2815_v31  ;;  %v2824_v28 = vsel %vm2680_vm3, %v2810_v21, -inf }
 0x4d7   : > { %v3818_v17 = vpop.f32.mrb[8].mxu1  ;;  %v2818_v41 = vsel %vm2680_vm3, %v2808_v8, -inf }
 0x4d8   : > { %2819 = vmax.xlane.f32.xlu0 %v2818_v41  ;;  %v2782_v56 = vpop.f32.mrb[9].mxu1  ;;  %v2803_v44 = vmul.f32 0.25, %v3818_v17 }
 0x4d9   : > { %v2801_v49 = vmul.f32 0.25, %v2782_v56  ;;  %v3819_v45 = vpop.f32.mrb[10].mxu1 }
 0x4da   : > { %2825 = vmax.xlane.f32.xlu1 %v2824_v28  ;;  %v2785_v19 = vpop.f32.mrb[11].mxu1  ;;  %v2804_v13 = vmul.f32 0.25, %v3819_v45  ;;  %v2813_v50 = vadd.f32 %v2805_v60, %v2803_v44  ;;  %v6039_v28 = vmov 0.0  }
 0x4db   : > { %v2802_v38 = vmul.f32 0.25, %v2785_v19  ;;  %v2811_v6 = vadd.f32 %v2805_v60, %v2801_v49  ;;  %v2276_v19 = vcombine.high %v1092_v53, %v6039_v28  ;;  %v2210_v44 = vcombine.high %v1091_v16, %v6039_v28 }
 0x4dc   : > { %2822 = vmax.xlane.f32.xlu0 %v2821_v61  ;;  %v2814_v22 = vadd.f32 %v2806_v55, %v2804_v13  ;;  %v2833_v25 = vsel %vm2680_vm3, %v2813_v50, -inf }
 0x4dd   : > { %v2812_v1 = vadd.f32 %v2806_v55, %v2802_v38  ;;  %v2827_v10 = vsel %vm2680_vm3, %v2811_v6, -inf  ;;  %v2283_v38 = vrot.slane %v1092_v53, %v4924_v5 }
 0x4de   : > { %v2836_v20 = vsel %vm2680_vm3, %v2814_v22, -inf }
 0x4df   : > { %v2830_v59 = vsel %vm2680_vm3, %v2812_v1, -inf }
 0x4e0   : > { %2828 = vmax.xlane.f32.xlu0 %v2827_v10  ;;  %2831 = vmax.xlane.f32.xlu1 %v2830_v59  ;;  %v2290_v10 = vrot.slane %v2276_v19, %v4924_v5 }
 0x4e4   : > { %2834 = vmax.xlane.f32.xlu0 %v2833_v25  ;;  %2837 = vmax.xlane.f32.xlu1 %v2836_v20 }
 0x563   : > { %v2817_v43 = vpop.xlane.xlu1 %2816 }
 0x564   : > { %v2839_v9 = vsub.f32 %v2807_v57, %v2817_v43  ;;  %v2217_v43 = vrot.slane %v1091_v16, %v4924_v5 }
 0x565   : > { %v2820_v62 = vpop.xlane.xlu0 %2819 }
 0x566   : > { %v2840_v40 = vsub.f32 %v2808_v8, %v2820_v62  ;;  %v2847_v27 = vmul.f32 1.442695, %v2839_v9  ;;  %v2224_v62 = vrot.slane %v2210_v44, %v4924_v5 }
 0x567   : > { %v2826_v11 = vpop.xlane.xlu1 %2825 }
 0x568   : > { %v2842_v29 = vsub.f32 %v2810_v21, %v2826_v11  ;;  %v2849_v30 = vmul.f32 1.442695, %v2840_v40 }
 0x569   : > { %v2823_v12 = vpop.xlane.xlu0 %2822 }
 0x56a   : > { %v2853_v42 = vmul.f32 1.442695, %v2842_v29  ;;  %v2841_v52 = vsub.f32 %v2809_v46, %v2823_v12 }
 0x56c   : > { %4034 = vpow2.f32 %v2853_v42  ;;  %v2851_v7 = vmul.f32 1.442695, %v2841_v52 }
 0x56d   : > { %4036 = vpow2.f32 %v2849_v30  ;;  %v2832_v35 = vpop.xlane.xlu1 %2831  ;;  %v2829_v15 = vpop.xlane.xlu0 %2828 }
 0x56e   : > { %4038 = vpow2.f32 %v2851_v7  ;;  %v2843_v24 = vsub.f32 %v2811_v6, %v2829_v15  ;;  %v2844_v37 = vsub.f32 %v2812_v1, %v2832_v35 }
 0x56f   : > { %4040 = vpow2.f32 %v2847_v27 }
 0x570   : > { %v2855_v0 = vmul.f32 1.442695, %v2843_v24  ;;  %v2857_v54 = vmul.f32 1.442695, %v2844_v37 }
 0x571   : > { %v2838_v63 = vpop.xlane.xlu1 %2837  ;;  %v2835_v60 = vpop.xlane.xlu0 %2834 }
 0x572   : > { %v2846_v2 = vsub.f32 %v2814_v22, %v2838_v63  ;;  %v2845_v36 = vsub.f32 %v2813_v50, %v2835_v60  ;;  %4042 = vpow2.f32 %v2855_v0 }
 0x573   : > { %4044 = vpow2.f32 %v2857_v54 }
 0x574   : > { %v2861_v39 = vmul.f32 1.442695, %v2846_v2  ;;  %v2859_v55 = vmul.f32 1.442695, %v2845_v36 }
 0x576   : > { %v5624_v14 = vpop.eup %4034  ;;  %4046 = vpow2.f32 %v2861_v39 }
 0x577   : > { %v5626_v18 = vpop.eup %4036  ;;  %v2872_v51 = vsel %vm2680_vm3, %v5624_v14, 0.0  ;;  %4048 = vpow2.f32 %v2859_v55 }
 0x578   : > { %v5630_v4 = vpop.eup %4038  ;;  %2873 = vadd.xlane.f32.xlu1 %v2872_v51  ;;  %v2866_v34 = vsel %vm2680_vm3, %v5626_v18, 0.0 }
 0x579   : > { %v2869_v33 = vsel %vm2680_vm3, %v5630_v4, 0.0  ;;  %v5634_v48 = vpop.eup %4040 }
 0x57a   : > { %2870 = vadd.xlane.f32.xlu0 %v2869_v33  ;;  %v2863_v3 = vsel %vm2680_vm3, %v5634_v48, 0.0 }
 0x57c   : > { %2867 = vadd.xlane.f32.xlu1 %v2866_v34  ;;  %v5648_v23 = vpop.eup %4042 }
 0x57d   : > { %v5650_v57 = vpop.eup %4044  ;;  %v2875_v31 = vsel %vm2680_vm3, %v5648_v23, 0.0 }
 0x57e   : > { %2864 = vadd.xlane.f32.xlu0 %v2863_v3  ;;  %v2878_v21 = vsel %vm2680_vm3, %v5650_v57, 0.0 }
 0x580   : > { %v5654_v8 = vpop.eup %4046 }
 0x581   : > { %v5658_v46 = vpop.eup %4048  ;;  %v2884_v17 = vsel %vm2680_vm3, %v5654_v8, 0.0 }
 0x582   : > { %v2881_v41 = vsel %vm2680_vm3, %v5658_v46, 0.0 }
 0x58d   : > { %2206 = vrot.lane.b32.xlu1 %v1092_v53, %s4386_s11 }
 0x594   : > { %2204 = vrot.lane.b32.xlu0 %v1091_v16, %s4386_s11  ;;  %s4240_s11 = scalar_lea.vmem %s5778_s21, 256 }
 0x595   : > { %p4241_p11 = scmp.ne.s32.totalorder %s5778_s21, %s4240_s11 }
 0x597   : > { %p4242_p6 = pnand %p4241_p11, %p6045_p8 }
 0x599   : > { %p4243_p7 = pneg %p4242_p6 }
 0x5b1   : > { %2876 = vadd.xlane.f32.xlu1 %v2875_v31 }
 0x5b3   : > { %2879 = vadd.xlane.f32.xlu0 %v2878_v21 }
 0x5b5   : > { %2885 = vadd.xlane.f32.xlu1 %v2884_v17 }
 0x5b7   : > { %2882 = vadd.xlane.f32.xlu0 %v2881_v41 }
 0x605   : > { %v2874_v56 = vpop.xlane.xlu1 %2873 }
 0x607   : > { %v2871_v49 = vpop.xlane.xlu0 %2870 }
 0x609   : > { %v2868_v45 = vpop.xlane.xlu1 %2867 }
 0x60a   : > { %4050 = vrcp.f32 %v2868_v45 }
 0x60b   : > { %v2865_v61 = vpop.xlane.xlu0 %2864 }
 0x60c   : > { %4052 = vrcp.f32 %v2865_v61 }
 0x60d   : > { %v2207_v13 = vpop.permute.xlu1 %2206  ;;  %4054 = vrcp.f32 %v2874_v56 }
 0x60e   : > { %v2291_v6 = vcombine.high %v2207_v13, %v6039_v28  ;;  %v2298_v1 = vrot.slane %v2207_v13, %v4924_v5  ;;  %4056 = vrcp.f32 %v2871_v49 }
 0x60f   : > { %v2205_v59 = vpop.permute.xlu0 %2204 }
 0x610   : > { %v2305_v50 = vrot.slane %v2291_v6, %v4924_v5  ;;  %v2306_v22 = vcombine.low %v2283_v38, %v2298_v1  ;;  %v2307_v25 = vcombine.high %v2283_v38, %v2298_v1  ;;  %v2225_v20 = vcombine.high %v2205_v59, %v6039_v28 }
 0x611   : > { %v2232_v40 = vrot.slane %v2205_v59, %v4924_v5 }
 0x612   : > { %v2314_v11 = vrot.slane %v2306_v22, %v6027_v26  ;;  %v2321_v9 = vrot.slane %v2307_v25, %v6027_v26  ;;  %v2322_v29 = vcombine.low %v2290_v10, %v2305_v50  ;;  %v2323_v30 = vcombine.high %v2290_v10, %v2305_v50 }
 0x613   : > { %v2239_v12 = vrot.slane %v2225_v20, %v4924_v5  ;;  %v2240_v42 = vcombine.low %v2217_v43, %v2232_v40  ;;  %v2241_v52 = vcombine.high %v2217_v43, %v2232_v40 }
 0x614   : > { %v2330_v27 = vrot.slane %v2322_v29, %v6027_v26  ;;  %v2337_v7 = vrot.slane %v2323_v30, %v6027_v26  ;;  %v2338_v51 = vcombine.high %v2314_v11, %v6039_v28  ;;  %v2339_v33 = vcombine.high %v2321_v9, %v6039_v28  ;;  %v4051_v53 = vpop.eup %4050 }
 0x615   : > { %v2248_v34 = vrot.slane %v2240_v42, %v6027_v26  ;;  %v2255_v3 = vrot.slane %v2241_v52, %v6027_v26  ;;  %v2256_v47 = vcombine.low %v2224_v62, %v2239_v12  ;;  %v2257_v58 = vcombine.high %v2224_v62, %v2239_v12 }
 0x616   : > { %v2340_v32 = vcombine.high %v2330_v27, %v6039_v28  ;;  %v2341_v16 = vcombine.high %v2337_v7, %v6039_v28  ;;  %v3709_v35 = vpack.c.bf16 %v2330_v27, %v2314_v11  ;;  %v3710_v15 = vpack.c.bf16 %v2337_v7, %v2321_v9  ;;  %v4053_v24 = vpop.eup %4052 }
 0x617   : > { %v2264_v63 = vrot.slane %v2256_v47, %v6027_v26  ;;  %v2271_v37 = vrot.slane %v2257_v58, %v6027_v26  ;;  %v2272_v60 = vcombine.high %v2248_v34, %v6039_v28  ;;  %v2273_v0 = vcombine.high %v2255_v3, %v6039_v28  ;;  %v4055_v19 = vpop.eup %4054 }
 0x618   : > { %v2597_v2 = vrot.slane %v3709_v35, %v4924_v5  ;;  %v2605_v54 = vrot.slane %v3710_v15, %v4924_v5  ;;  %v3713_v36 = vpack.c.bf16 %v2340_v32, %v2338_v51  ;;  %v3714_v39 = vpack.c.bf16 %v2341_v16, %v2339_v33  ;;  %v4057_v10 = vpop.eup %4056 }
 0x619   : > { %v2274_v55 = vcombine.high %v2264_v63, %v6039_v28  ;;  %v2275_v31 = vcombine.high %v2271_v37, %v6039_v28  ;;  %v3707_v21 = vpack.c.bf16 %v2264_v63, %v2248_v34  ;;  %v3708_v17 = vpack.c.bf16 %v2271_v37, %v2255_v3 }
 0x61a   : > { %v2646_v41 = vrot.slane %v3713_v36, %v4924_v5  ;;  %v2654_v56 = vrot.slane %v3714_v39, %v4924_v5  ;;  %v2888_v49 = vmul.f32 %v4053_v24, %v5634_v48  ;;  %v2890_v45 = vmul.f32 %v4051_v53, %v5626_v18  ;;  %v4026_v24 = vld [vmem:[%s6040_s10] sm:$0xff]  }
 0x61b   : > { %v2581_v61 = vrot.slane %v3707_v21, %v4924_v5  ;;  %v2589_v44 = vrot.slane %v3708_v17, %v4924_v5  ;;  %v3711_v13 = vpack.c.bf16 %v2274_v55, %v2272_v60  ;;  %v3712_v38 = vpack.c.bf16 %v2275_v31, %v2273_v0  ;;  %3833 = vmatpush3.bf16.msra.mxu0 %v4026_v24 }
 0x61c   : > { %v2903_v6 = vpack.c.bf16 %v2890_v45, %v2888_v49  ;;  %v2614_v1 = vcombine.low %v2597_v2, %v2605_v54  ;;  %v2663_v25 = vcombine.low %v2646_v41, %v2654_v56  ;;  %v2892_v9 = vmul.f32 %v4057_v10, %v5630_v4  ;;  %3834 = vmatprep.subr.bf16.mxu0 %v6039_v28 }
 0x61d   : > { %v2630_v59 = vrot.slane %v3711_v13, %v4924_v5  ;;  %v2638_v50 = vrot.slane %v3712_v38, %v4924_v5  ;;  %v2606_v22 = vcombine.low %v2581_v61, %v2589_v44  ;;  %v2894_v42 = vmul.f32 %v4055_v19, %v5624_v14 }
 0x61e   : > { %3822 = vmatprep.mubr.msk.bf16.mxu1 %vm2680_vm3, %v2903_v6  ;;  %v2621_v48 = vrot.slane %v2614_v1, %v6027_v26  ;;  %v2670_v40 = vrot.slane %v2663_v25, %v6027_v26 }
 0x61f   : > { %v2613_v18 = vrot.slane %v2606_v22, %v6027_v26  ;;  %v2655_v20 = vcombine.low %v2630_v59, %v2638_v50  ;;  %v2904_v27 = vpack.c.bf16 %v2894_v42, %v2892_v9  ;;  %v4027_v59 = vld [vmem:[%s6040_s10 + $0x8] sm:$0xff]  }
 0x620   : > { %3835 = vmatpush3.bf16.msra.mxu0 %v4027_v59 }
 0x621   : > { %v2622_v43 = vcombine.low %v2613_v18, %v2621_v48  ;;  %v2662_v62 = vrot.slane %v2655_v20, %v6027_v26  ;;  %3836 = vmatprep.subr.bf16.mxu0 %v6039_v28 }
 0x623   : > { %v2671_v11 = vcombine.low %v2662_v62, %v2670_v40  ;;  %v2676_v30 = vshrl.u32 %v2622_v43, 16 }
 0x625   : > { %v2674_v29 = vpack.i.b16 %v2671_v11, %v2622_v43  ;;  %v2677_v12 = vshrl.u32 %v2671_v11, 16 }
 0x627   : > { %3820 = vmatprep.subr.bf16.mxu1 %v2674_v29  ;;  %v2678_v52 = vpack.i.b16 %v2677_v12, %v2676_v30 }
 0x628   : > { %3821 = vmatpush3.bf16.msra.mxu1 %v2674_v29 }
 0x629   : > { %3826 = vmatprep.subr.bf16.mxu1 %v2678_v52 }
 0x62b   : > { %3823 = vmatmul.mubr.msk.bf16.vlgmr.msra.gmra.mrb[12].mxu1 %vm2680_vm3, %v2904_v27  ;;  %v4028_v27 = vld [vmem:[%s6040_s10 + $0x10] sm:$0xff]  }
 0x62c   : > { %3827 = vmatpush3.bf16.msra.mxu1 %v2678_v52  ;;  %3837 = vmatpush3.bf16.msra.mxu0 %v4028_v27 }
 0x62d   : > { %3838 = vmatprep.subr.bf16.mxu0 %v6039_v28 }
 0x63e   : > { %v2877_v7 = vpop.xlane.xlu1 %2876 }
 0x63f   : > { %4058 = vrcp.f32 %v2877_v7 }
 0x640   : > { %v2880_v51 = vpop.xlane.xlu0 %2879 }
 0x641   : > { %4060 = vrcp.f32 %v2880_v51 }
 0x642   : > { %v2886_v33 = vpop.xlane.xlu1 %2885 }
 0x643   : > { %4062 = vrcp.f32 %v2886_v33 }
 0x644   : > { %v2883_v4 = vpop.xlane.xlu0 %2882 }
 0x645   : > { %4064 = vrcp.f32 %v2883_v4 }
 0x649   : > { %v4059_v34 = vpop.eup %4058 }
 0x64a   : > { %v2896_v14 = vmul.f32 %v4059_v34, %v5648_v23 }
 0x64b   : > { %v4061_v3 = vpop.eup %4060 }
 0x64c   : > { %v2898_v47 = vmul.f32 %v4061_v3, %v5650_v57 }
 0x64d   : > { %v4063_v58 = vpop.eup %4062 }
 0x64e   : > { %v2905_v53 = vpack.c.bf16 %v2898_v47, %v2896_v14  ;;  %v2902_v16 = vmul.f32 %v4063_v58, %v5654_v8 }
 0x64f   : > { %v4065_v32 = vpop.eup %4064 }
 0x650   : > { %v2900_v35 = vmul.f32 %v4065_v32, %v5658_v46  ;;  %3828 = vmatprep.mubr.msk.bf16.mxu1 %vm2680_vm3, %v2905_v53 }
 0x652   : > { %v2906_v15 = vpack.c.bf16 %v2902_v16, %v2900_v35 }
 0x654   : > { %3829 = vmatmul.mubr.msk.bf16.vlgmr.msra.gmra.mrb[16].mxu1 %vm2680_vm3, %v2906_v15 }
 0x6fe   : > { %v3824_v23 = vpop.f32.mrb[12].mxu1 }
 0x6ff   : > { %v2947_v57 = vpop.f32.mrb[13].mxu1 }
 0x700   : > { %v3825_v63 = vpop.f32.mrb[14].mxu1 }
 0x701   : > { %v2950_v37 = vpop.f32.mrb[15].mxu1 }
 0x727   : > { %v3830_v60 = vpop.f32.mrb[16].mxu1 }
 0x728   : > { %v3033_v8 = vcombine.low %v3824_v23, %v3830_v60  ;;  %v3034_v0 = vcombine.high %v3824_v23, %v3830_v60  ;;  %v3002_v46 = vpop.f32.mrb[17].mxu1 }
 0x729   : > { %v3017_v2 = vcombine.low %v2947_v57, %v3002_v46  ;;  %v3018_v54 = vcombine.high %v2947_v57, %v3002_v46  ;;  %v3831_v36 = vpop.f32.mrb[18].mxu1 }
 0x72a   : > { %v3041_v39 = vrot.slane %v3033_v8, %v4924_v5  ;;  %v3048_v55 = vrot.slane %v3034_v0, %v4924_v5  ;;  %v3101_v31 = vcombine.low %v3825_v63, %v3831_v36  ;;  %v3102_v21 = vcombine.high %v3825_v63, %v3831_v36  ;;  %v3005_v17 = vpop.f32.mrb[19].mxu1 }
 0x72b   : > { %v3025_v41 = vrot.slane %v3017_v2, %v4924_v5  ;;  %v3032_v56 = vrot.slane %v3018_v54, %v4924_v5  ;;  %v3085_v49 = vcombine.low %v2950_v37, %v3005_v17  ;;  %v3086_v45 = vcombine.high %v2950_v37, %v3005_v17 }
 0x72c   : > { %v3109_v19 = vrot.slane %v3101_v31, %v4924_v5  ;;  %v3116_v61 = vrot.slane %v3102_v21, %v4924_v5 }
 0x72d   : > { %v3049_v44 = vcombine.low %v3025_v41, %v3041_v39  ;;  %v3050_v13 = vcombine.high %v3025_v41, %v3041_v39  ;;  %v3065_v38 = vcombine.low %v3032_v56, %v3048_v55  ;;  %v3066_v6 = vcombine.high %v3032_v56, %v3048_v55 }
 0x72e   : > { %v3093_v1 = vrot.slane %v3085_v49, %v4924_v5  ;;  %v3100_v10 = vrot.slane %v3086_v45, %v4924_v5 }
 0x72f   : > { %v3057_v50 = vrot.slane %v3049_v44, %v6027_v26  ;;  %v3064_v22 = vrot.slane %v3050_v13, %v6027_v26  ;;  %v3073_v25 = vrot.slane %v3065_v38, %v6027_v26  ;;  %v3080_v18 = vrot.slane %v3066_v6, %v6027_v26  ;;  %v3727_v6 = vld [vmem:[%s774_s13] ss:$0 sm:$0xff]  ;;  %s6044_s13 = smov %s6043_s24 }
 0x730   : > { %v3117_v48 = vcombine.low %v3093_v1, %v3109_v19  ;;  %v3118_v20 = vcombine.high %v3093_v1, %v3109_v19  ;;  %v3133_v43 = vcombine.low %v3100_v10, %v3116_v61  ;;  %v3134_v62 = vcombine.high %v3100_v10, %v3116_v61 }
 0x731   : > { %v3153_v40 = vcombine.low %v3057_v50, %v3064_v22  ;;  %v3723_v11 = vcombine.high %v3057_v50, %v3064_v22  ;;  %v3169_v9 = vcombine.low %v3073_v25, %v3080_v18  ;;  %v3724_v29 = vcombine.high %v3073_v25, %v3080_v18 }
 0x732   : > { %v3125_v30 = vrot.slane %v3117_v48, %v6027_v26  ;;  %v3132_v12 = vrot.slane %v3118_v20, %v6027_v26  ;;  %v3141_v42 = vrot.slane %v3133_v43, %v6027_v26  ;;  %v3148_v52 = vrot.slane %v3134_v62, %v6027_v26  ;;  %v3733_v43 = vld [vmem:[%s777_s17] ss:$0 sm:$0xff]  ;;  %s4244_s17 = sshll.u32 %s4397_s12, 4  ;;  %s4245_s17 = int_to_ptr.vmem [resolvable:$false] %s4244_s17 }
 0x733   : > { %v3160_v7 = vrot.slane %v3153_v40, %v4924_v5  ;;  %v3168_v51 = vrot.slane %v3723_v11, %v4924_v5  ;;  %v3176_v33 = vrot.slane %v3169_v9, %v4924_v5  ;;  %v3184_v4 = vrot.slane %v3724_v29, %v4924_v5  ;;  %v4066_v29 = vld [vmem:[%s4819_s6] sm:$0xff]  ;;  %p4247_p0 = scmp.lt.s32.totalorder %s5778_s21, %s4245_s17 }
 0x734   : > { %v3221_v34 = vcombine.low %v3125_v30, %v3132_v12  ;;  %v3725_v3 = vcombine.high %v3125_v30, %v3132_v12  ;;  %v3237_v14 = vcombine.low %v3141_v42, %v3148_v52  ;;  %v3726_v47 = vcombine.high %v3141_v42, %v3148_v52  ;;  %v4067_v52 = vld [vmem:[%s4819_s6 + $0x8] sm:$0xff] }
 0x735   : > { %v3186_v58 = vcombine.high %v3160_v7, %v3168_v51  ;;  %v3202_v53 = vcombine.high %v3176_v33, %v3184_v4  ;;  %v3185_v32 = vcombine.low %v3160_v7, %v3168_v51  ;;  %v3201_v16 = vcombine.low %v3176_v33, %v3184_v4 }
 0x736   : > { %v3228_v35 = vrot.slane %v3221_v34, %v4924_v5  ;;  %v3236_v15 = vrot.slane %v3725_v3, %v4924_v5  ;;  %v3244_v24 = vrot.slane %v3237_v14, %v4924_v5  ;;  %v3252_v23 = vrot.slane %v3726_v47, %v4924_v5  ;;  %v4029_v5 = vld [vmem:[%s6040_s10 + $0x18] sm:$0xff]  }
 0x737   : > { %v3200_v57 = vrot.slane %v3186_v58, %v6027_v26  ;;  %v3216_v63 = vrot.slane %v3202_v53, %v6027_v26  ;;  %v3193_v37 = vrot.slane %v3185_v32, %v6027_v26  ;;  %v3209_v60 = vrot.slane %v3201_v16, %v6027_v26  ;;  %3839 = vmatpush3.bf16.msra.mxu0 %v4029_v5 }
 0x738   : > { %v3254_v8 = vcombine.high %v3228_v35, %v3236_v15  ;;  %v3270_v0 = vcombine.high %v3244_v24, %v3252_v23  ;;  %v3253_v46 = vcombine.low %v3228_v35, %v3236_v15  ;;  %v3269_v28 = vcombine.low %v3244_v24, %v3252_v23 }
 0x739   : > { %v3219_v2 = vcombine.low %v3200_v57, %v3216_v63  ;;  %v3218_v54 = vcombine.high %v3193_v37, %v3209_v60  ;;  %v3220_v36 = vcombine.high %v3200_v57, %v3216_v63  ;;  %v3217_v39 = vcombine.low %v3193_v37, %v3209_v60 }
 0x73a   : > { %v3268_v55 = vrot.slane %v3254_v8, %v6027_v26  ;;  %v3284_v31 = vrot.slane %v3270_v0, %v6027_v26  ;;  %v3261_v21 = vrot.slane %v3253_v46, %v6027_v26  ;;  %v3277_v17 = vrot.slane %v3269_v28, %v6027_v26 }
 0x73b   : > { %3299 = vrot.lane.b32.xlu1 %v3219_v2, %s4394_s30  ;;  %3291 = vrot.lane.b32.xlu0 %v3218_v54, %s4395_s0 }
 0x73c   : > { %v3287_v41 = vcombine.low %v3268_v55, %v3284_v31  ;;  %v3286_v56 = vcombine.high %v3261_v21, %v3277_v17  ;;  %v3288_v49 = vcombine.high %v3268_v55, %v3284_v31  ;;  %v3285_v45 = vcombine.low %v3261_v21, %v3277_v17 }
 0x73f   : > { %3301 = vrot.lane.b32.xlu0 %v3287_v41, %s4394_s30  ;;  %3293 = vrot.lane.b32.xlu1 %v3286_v56, %s4395_s0  ;;  %s3735_s30 = sshll.u32 %s5979_s14, 1  ;;  %s3736_s0 = sshll.u32 %s5980_s2, 2 }
 0x743   : > { %3309 = vrot.lane.b32.xlu0 %v3288_v49, %s4396_s15  ;;  %3307 = vrot.lane.b32.xlu1 %v3220_v36, %s4396_s15  ;;  %s3433_s15 = sadd.s32 %s3736_s0, %s3735_s30  ;;  %s4246_s30 = scalar_lea.vmem %s4245_s17, 512 }
 0x744   : > { %s3737_s8 = sshll.u32 %s3433_s15, 7  ;;  %p4248_p2 = scmp.lt.s32.totalorder %s4246_s30, %s4240_s11 }
 0x745   : > { %s5785_s20 = scalar_lea.hbm %s6043_s24, %s3737_s8 }
 0x746   : > { %p4249_p1 = por %p4248_p2, %p4247_p0 }
 0x748   : > { %p4250_p9 = pnand %p4249_p1, %p4243_p7 }
 0x7ad   : > { %v3300_v19 = vpop.permute.xlu1 %3299  ;;  %v3292_v61 = vpop.permute.xlu0 %3291 }
 0x7ae   : > { %v3313_v26 = vsel %vm2680_vm3, %v3217_v39, %v3292_v61 }
 0x7af   : > { %v3316_v59 = vsel %vm3315_vm4, %v3313_v26, %v3300_v19 }
 0x7b1   : > { %v3302_v44 = vpop.permute.xlu0 %3301  ;;  %v3294_v13 = vpop.permute.xlu1 %3293 }
 0x7b2   : > { %v3314_v38 = vsel %vm2680_vm3, %v3285_v45, %v3294_v13 }
 0x7b3   : > { %v3317_v10 = vsel %vm3315_vm4, %v3314_v38, %v3302_v44 }
 0x7b5   : > { %v3310_v1 = vpop.permute.xlu0 %3309  ;;  %v3308_v50 = vpop.permute.xlu1 %3307 }
 0x7b6   : > { %v3320_v22 = vsel %vm3318_vm5, %v3317_v10, %v3310_v1  ;;  %v3319_v25 = vsel %vm3318_vm5, %v3316_v59, %v3308_v50 }
 0x7b7   : > { %v3329_v18 = vmul.f32 %v3727_v6, %v3320_v22  ;;  %v3328_v48 = vmul.f32 %v3727_v6, %v3319_v25 }
 0x7b9   : > { %v3330_v20 = vpack.c.bf16 %v3329_v18, %v3328_v48 }
 0x7bb   : > { %3841 = vmatmul.mubr.msk.bf16.vlgmr.msra.gmra.mrb[8].mxu0 %vm783_vm0, %v3330_v20 }
 0x88e   : > { %v3400_v62 = vpop.f32.mrb[8].mxu0 }
 0x88f   : > { %v3414_v40 = vmul.f32 %v3733_v43, %v3400_v62  ;;  %v3842_v11 = vpop.f32.mrb[9].mxu0 }
 0x890   : > { %v3403_v9 = vpop.f32.mrb[10].mxu0 }
 0x891   : > { %v3416_v30 = vadd.f32 %v4066_v29, %v3414_v40  ;;  %v3415_v12 = vmul.f32 %v3733_v43, %v3403_v9  ;;  %v3843_v42 = vpop.f32.mrb[11].mxu0 }
 0x893   : > { %3418 = vst.msk [vmem:[%s750_s19] sm:$0xff] %vm783_vm0, %v3416_v30  ;;  %v3417_v27 = vadd.f32 %v4067_v52, %v3415_v12 }
 0x895   : > { %3419 = vst.msk [vmem:[%s750_s19 + $0x8] sm:$0xff] %vm783_vm0, %v3417_v27 }
 0x896   : > { %4253 = shalt.err (!%p4250_p9)
}
 0x897   : > { %s4254_s6 = scalar_lea.hbm %s5785_s20, 256  ;;  %s4258_s15 = scalar_lea.hbm %s6044_s13, 1024 }
 0x898   : > { %p4255_p12 = scmp.ne.s32.totalorder %s5785_s20, %s4254_s6  ;;  %p4259_p3 = scmp.lt.u32.totalorder %s5785_s20, %s6044_s13 }
 0x899   : > { %p4260_p4 = scmp.lt.u32.totalorder %s4258_s15, %s4254_s6  ;;  %p4262_p11 = scmp.lt.u32.totalorder %s4254_s6, %s5785_s20 }
 0x89a   : > { %p4256_p13 = pnand %p4255_p12, %p6045_p8 }
 0x89b   : > { %p4261_p10 = por %p4260_p4, %p4259_p3 }
 0x89c   : > { %p4257_p5 = pneg %p4256_p13 }
 0x89d   : > { %p4263_p6 = por %p4262_p11, %p4261_p10 }
 0x89f   : > { %p4264_p7 = pnand %p4263_p6, %p4257_p5 }
 0x8a1   : > { %4267 = shalt.err (!%p4264_p7)
}
 0x8a2   : > { %s4398_s14 = smov 128  }
 0x8a3   : > { %3866 = dma.vmem_to_hbm [thread:$0]  (%p6045_p8), %s5778_s21, 256, %s5785_s20, %s5788_s26, %s4398_s14, %s4398_s14, %s4391_s27  }
 0x8a4 PF: > { %s6046_s2 = sld [smem:[#allocation18_spill]]  ;;  %s6047_s24 = sld [smem:[#allocation28_spill]] }
 0x8a5   : > { %p3901_p0 = scmp.ge.s32.totalorder %s4374_s1, 2 }
 0x8aa   : > { %s3451_s11 = sand.u32 1, %s6046_s2   ;;  %p6048_p2 = scmp.ne.s32.totalorder %s6047_s24, 0 }
 0x8ab   : > { %s3452_s12 = scalar_lea.sflag [#allocation4], %s3451_s11 }
 0x8ac   : > { %p3889_p1 = pnand %p3901_p0, %p6048_p2 }
 0x8ae   : > { %4329 = dma.done.wait (!%p3889_p1), %s3452_s12, 256  }
 0x8af   : > { %4331 = vsyncadd (!%p3889_p1), %s3452_s12, 4294967040  ;;  %s33_s1 = sadd.s32 1, %s4374_s1   ;;  %s6049_s5 = sld [smem:[#allocation19_spill]] }
 0x8b0   : > { %p30_p9 = scmp.ge.s32.totalorder %s33_s1, 6   ;;  %s6050_s26 = sld [smem:[#allocation27_spill]] }
 0x8b1   : > { %s6051_s21 = sld [smem:[#allocation26_spill]]  ;;  %s6052_s30 = sld [smem:[#allocation22_spill]] }
 0x8b2   : > { %s6053_s20 = sld [smem:[#allocation24_spill]]  ;;  %s6054_s19 = sld [smem:[#allocation25_spill]] }
 0x8b3   : > { %s6055_s24 = smov %s4338_s25  ;;  %s6057_s27 = smov %s4350_s28 }
 0x8b4   : > { %s6058_s28 = smov %s4354_s29  ;;  %s6060_s0 = smov %s4366_s18 }
 0x8b5   : > { %s6056_s25 = smov %s6049_s5  ;;  %32 = sbr.rel (!%p30_p9) target bundleno = 26 (0x1a), region = 180 }
 0x8b7   : > { %s6059_s29 = smov %s6051_s21 }
 0x8b8   : > { %s6061_s18 = smov %s6053_s20 }
 0x8bc   :  { %3457 = vsyncpa [#allocation3], 1 }
 0x8bd   :  { %3459 = vsyncpa [#allocation3 + $0x1], 1 }
 0x8be   :  { %3460 = vsyncpa [#allocation6], 1 }
 0x8bf   :  { %3461 = vsyncpa [#allocation9], 1 }
 0x8c0   :  { %3462 = vsyncpa [#allocation4], 1 }
 0x8c1   :  { %3464 = vsyncpa [#allocation4 + $0x1], 1 }

</bundles_post_ra>
